<compile_context>
chip_gen: v7x
topology: tpu7x:2x2x1
jax: 0.10.0
libtpu: 0.0.40
codegen_flags: <defaults>
</compile_context>

<pallas_src>
import jax
import jax.numpy as jnp
from jax.experimental import pallas as pl
from jax.experimental.pallas import tpu as pltpu


def _attention_kernel(enc_ref, h_ref, w_e_ref, b_e_ref, w_d_ref, b_d_ref,
                      w_f_ref, awe_ref, alpha_obj_ref, alpha_ctx_ref):
    bb, n_tot, e_dim = enc_ref.shape          # (BB, N+Nc, E)
    n_obj = alpha_obj_ref.shape[1]
    a2 = w_e_ref.shape[1]                     # 2 * attention_dim

    # att2 = decoder_att(decoder_hidden); weights pre-duplicated to (D, 2A)
    # so both segment halves come out of one matmul.                (BB, 2A)
    att2 = jnp.dot(h_ref[...], w_d_ref[...],
                   preferred_element_type=jnp.float32) + b_d_ref[...]

    # One stacked encoder matmul for both branches:
    #   (BB*(N+Nc), E) @ (E, 2A)  — obj weights in cols [:A], ctx in [A:].
    enc = enc_ref[...]                                              # (BB, Nt, E)
    att1 = jnp.dot(enc.reshape(bb * n_tot, e_dim), w_e_ref[...],
                   preferred_element_type=jnp.float32)
    att1 = att1.reshape(bb, n_tot, a2) + b_e_ref[...]               # (BB, Nt, 2A)

    # relu(att1 + att2.unsqueeze(1))
    act = jnp.maximum(att1 + att2[:, None, :], 0.0)                 # (BB, Nt, 2A)

    # full_att: segment-matched rows (zeros in the other segment's half), so a
    # single lane reduce produces both score streams.  The full_att bias is a
    # constant before the softmax and cancels exactly.
    score = jnp.sum(act * w_f_ref[...][None, :, :], axis=-1)        # (BB, Nt)

    def _softmax(s):
        m = jnp.max(s, axis=-1, keepdims=True)
        ex = jnp.exp(s - m)
        return ex / jnp.sum(ex, axis=-1, keepdims=True)

    alpha_o = _softmax(score[:, :n_obj])                            # (BB, N)
    alpha_c = _softmax(score[:, n_obj:])                            # (BB, Nc)

    # Attention-weighted encodings: VPU multiply + sublane reduce (no M=1 MXU
    # matmuls).
    awe_o = jnp.sum(alpha_o[:, :, None] * enc[:, :n_obj, :], axis=1)  # (BB, E)
    awe_c = jnp.sum(alpha_c[:, :, None] * enc[:, n_obj:, :], axis=1)  # (BB, E)

    # Static slice stores into the dense (BB, 2E) output block.
    awe_ref[:, :e_dim] = awe_o
    awe_ref[:, e_dim:] = awe_c
    alpha_obj_ref[...] = alpha_o
    alpha_ctx_ref[...] = alpha_c


def _pick_batch_block(batch_padded, block_batch):
    """batch_padded is a multiple of 8.  Default: one grid step (bb = full
    padded batch).  If block_batch is given (e.g. to split work across v7x
    TensorCores for large batches), round to a multiple of 8 that divides the
    padded batch."""
    if block_batch is None or block_batch >= batch_padded:
        return batch_padded
    bb = max(8, (block_batch // 8) * 8)
    while batch_padded % bb:
        bb -= 8
    return bb


def attention_forward(enc_obj, enc_ctx, dec_hidden, params,
                      *, block_batch=None, vmem_limit_bytes=None):
    B, N, E = enc_obj.shape
    _, Nc, _ = enc_ctx.shape
    D = dec_hidden.shape[1]
    A = params["w_eo"].shape[1]
    Nt = N + Nc

    # Pad batch to a multiple of 8: sublane-dense 2D blocks and no per-sample
    # grid steps for awkward (e.g. prime) batch sizes.
    Bp = ((B + 7) // 8) * 8
    enc_full = jnp.concatenate([enc_obj, enc_ctx], axis=1)           # (B, Nt, E)
    h2 = dec_hidden                                                  # (B, D)
    if Bp != B:
        pad = Bp - B
        enc_full = jnp.pad(enc_full, ((0, pad), (0, 0), (0, 0)))
        h2 = jnp.pad(h2, ((0, pad), (0, 0)))

    bb = _pick_batch_block(Bp, block_batch)
    grid = (Bp // bb,)

    # Stacked weights: obj half in columns [:A], ctx half in [A:2A].
    w_e = jnp.concatenate([params["w_eo"], params["w_ec"]], axis=1)  # (E, 2A)
    b_e = jnp.concatenate([params["b_eo"], params["b_ec"]], axis=1)  # (1, 2A)
    w_d = jnp.concatenate([params["w_d"], params["w_d"]], axis=1)    # (D, 2A)
    b_d = jnp.concatenate([params["b_d"], params["b_d"]], axis=1)    # (1, 2A)
    # Segment-matched full_att rows (zeros outside the row's own half).
    zero_a = jnp.zeros((A,), jnp.float32)
    row_o = jnp.concatenate([params["w_fo"][:, 0], zero_a])          # (2A,)
    row_c = jnp.concatenate([zero_a, params["w_fc"][:, 0]])          # (2A,)
    w_f = jnp.concatenate([jnp.tile(row_o[None, :], (N, 1)),
                           jnp.tile(row_c[None, :], (Nc, 1))], axis=0)  # (Nt, 2A)

    in_specs = [
        pl.BlockSpec((bb, Nt, E), lambda b: (b, 0, 0)),   # encoder (obj++ctx)
        pl.BlockSpec((bb, D), lambda b: (b, 0)),          # decoder_hidden
        pl.BlockSpec((E, 2 * A), lambda b: (0, 0)),       # stacked encoder_att W
        pl.BlockSpec((1, 2 * A), lambda b: (0, 0)),       # stacked encoder_att b
        pl.BlockSpec((D, 2 * A), lambda b: (0, 0)),       # duplicated decoder_att W
        pl.BlockSpec((1, 2 * A), lambda b: (0, 0)),       # duplicated decoder_att b
        pl.BlockSpec((Nt, 2 * A), lambda b: (0, 0)),      # segment full_att rows
    ]
    out_specs = [
        pl.BlockSpec((bb, 2 * E), lambda b: (b, 0)),      # attention-weighted enc
        pl.BlockSpec((bb, N), lambda b: (b, 0)),          # alpha_obj
        pl.BlockSpec((bb, Nc), lambda b: (b, 0)),         # alpha_context
    ]
    out_shape = (
        jax.ShapeDtypeStruct((Bp, 2 * E), jnp.float32),
        jax.ShapeDtypeStruct((Bp, N), jnp.float32),
        jax.ShapeDtypeStruct((Bp, Nc), jnp.float32),
    )

    awe, a_o, a_c = pl.pallas_call(
        _attention_kernel,
        out_shape=out_shape,
        grid_spec=pltpu.PrefetchScalarGridSpec(
            num_scalar_prefetch=0,
            grid=grid,
            in_specs=in_specs,
            out_specs=out_specs),
        compiler_params=pltpu.CompilerParams(
            dimension_semantics=("parallel",),
            vmem_limit_bytes=vmem_limit_bytes),
    )(enc_full, h2, w_e, b_e, w_d, b_d, w_f)

    # Drop padded batch rows (outputs are already lane-dense 2D).
    return awe[:B], a_o[:B], a_c[:B]


def attention_ref(enc_obj, enc_ctx, h, p):
    """Plain-JAX reference mirroring the PyTorch forward (biases included)."""
    att1o = enc_obj @ p["w_eo"] + p["b_eo"][0]
    att1c = enc_ctx @ p["w_ec"] + p["b_ec"][0]
    att2 = h @ p["w_d"] + p["b_d"][0]
    so = (jax.nn.relu(att1o + att2[:, None, :]) @ p["w_fo"])[..., 0] + p["b_fo"][0, 0]
    ao = jax.nn.softmax(so, axis=1)
    awo = jnp.sum(enc_obj * ao[..., None], axis=1)
    sc = (jax.nn.relu(att1c + att2[:, None, :]) @ p["w_fc"])[..., 0] + p["b_fc"][0, 0]
    ac = jax.nn.softmax(sc, axis=1)
    awc = jnp.sum(enc_ctx * ac[..., None], axis=1)
    return jnp.concatenate([awo, awc], axis=1), ao, ac


def init_params(key, encoder_dim, decoder_dim, attention_dim):
    ks = jax.random.split(key, 10)
    f32 = jnp.float32
    s = 0.1
    return {
        # weights pre-transposed to (in_features, out_features)
        "w_eo": s * jax.random.normal(ks[0], (encoder_dim, attention_dim), f32),
        "b_eo": s * jax.random.normal(ks[1], (1, attention_dim), f32),
        "w_ec": s * jax.random.normal(ks[2], (encoder_dim, attention_dim), f32),
        "b_ec": s * jax.random.normal(ks[3], (1, attention_dim), f32),
        "w_d":  s * jax.random.normal(ks[4], (decoder_dim, attention_dim), f32),
        "b_d":  s * jax.random.normal(ks[5], (1, attention_dim), f32),
        "w_fo": s * jax.random.normal(ks[6], (attention_dim, 1), f32),
        "b_fo": s * jax.random.normal(ks[7], (1, 1), f32),
        "w_fc": s * jax.random.normal(ks[8], (attention_dim, 1), f32),
        "b_fc": s * jax.random.normal(ks[9], (1, 1), f32),
    }


if __name__ == "__main__":
    B, N_obj, N_ctx = 8, 8, 16
    encoder_dim, decoder_dim, attention_dim = 32, 24, 40

    key = jax.random.PRNGKey(0)
    k_p, k_o, k_c, k_h = jax.random.split(key, 4)
    params = init_params(k_p, encoder_dim, decoder_dim, attention_dim)

    enc_obj = jax.random.normal(k_o, (B, N_obj, encoder_dim), jnp.float32)
    enc_ctx = jax.random.normal(k_c, (B, N_ctx, encoder_dim), jnp.float32)
    dec_hidden = jax.random.normal(k_h, (B, decoder_dim), jnp.float32)

    # Main test: multiple-of-8 batch -> single grid step, no padding.
    awe, alpha_obj, alpha_ctx = attention_forward(enc_obj, enc_ctx, dec_hidden, params)
    jax.block_until_ready((awe, alpha_obj, alpha_ctx))

    awe_r, ao_r, ac_r = attention_ref(enc_obj, enc_ctx, dec_hidden, params)
    assert awe.shape == (B, 2 * encoder_dim)
    assert alpha_obj.shape == (B, N_obj) and alpha_ctx.shape == (B, N_ctx)
    assert jnp.allclose(awe, awe_r, rtol=1e-3, atol=1e-3)
    assert jnp.allclose(alpha_obj, ao_r, rtol=1e-3, atol=1e-3)
    assert jnp.allclose(alpha_ctx, ac_r, rtol=1e-3, atol=1e-3)

    # Secondary test: awkward batch size exercises the pad-to-8 path.
    Bs = 5
    awe2, ao2, ac2 = attention_forward(enc_obj[:Bs], enc_ctx[:Bs],
                                       dec_hidden[:Bs], params)
    jax.block_until_ready((awe2, ao2, ac2))
    awe2_r, ao2_r, ac2_r = attention_ref(enc_obj[:Bs], enc_ctx[:Bs],
                                         dec_hidden[:Bs], params)
    assert awe2.shape == (Bs, 2 * encoder_dim)
    assert jnp.allclose(awe2, awe2_r, rtol=1e-3, atol=1e-3)
    assert jnp.allclose(ao2, ao2_r, rtol=1e-3, atol=1e-3)
    assert jnp.allclose(ac2, ac2_r, rtol=1e-3, atol=1e-3)

    print("KERNEL_OK")
</pallas_src>

<mosaic_0001>
module attributes {stable_mosaic.version = 11 : i64} {
  func.func @_attention_kernel(%arg0: i32, %arg1: memref<8x24x32xf32, #tpu.memory_space<vmem>>, %arg2: memref<8x24xf32, #tpu.memory_space<vmem>>, %arg3: memref<32x80xf32, #tpu.memory_space<vmem>>, %arg4: memref<1x80xf32, #tpu.memory_space<vmem>>, %arg5: memref<24x80xf32, #tpu.memory_space<vmem>>, %arg6: memref<1x80xf32, #tpu.memory_space<vmem>>, %arg7: memref<24x80xf32, #tpu.memory_space<vmem>>, %arg8: memref<8x64xf32, #tpu.memory_space<vmem>>, %arg9: memref<8x8xf32, #tpu.memory_space<vmem>>, %arg10: memref<8x16xf32, #tpu.memory_space<vmem>>) attributes {dimension_semantics = [#tpu.dimension_semantics<parallel>], iteration_bounds = array<i64: 1>, scalar_prefetch = 0 : i64, scratch_operands = 0 : i64, tpu.core_type = #tpu.core_type<tc>, window_params = [{transform_indices = @transform_0, window_bounds = array<i64: 8, 24, 32>}, {transform_indices = @transform_1, window_bounds = array<i64: 8, 24>}, {pipeline_mode = #tpu.pipeline_mode<synchronous>, transform_indices = @transform_2, window_bounds = array<i64: 32, 80>}, {pipeline_mode = #tpu.pipeline_mode<synchronous>, transform_indices = @transform_3, window_bounds = array<i64: 1, 80>}, {pipeline_mode = #tpu.pipeline_mode<synchronous>, transform_indices = @transform_4, window_bounds = array<i64: 24, 80>}, {pipeline_mode = #tpu.pipeline_mode<synchronous>, transform_indices = @transform_5, window_bounds = array<i64: 1, 80>}, {pipeline_mode = #tpu.pipeline_mode<synchronous>, transform_indices = @transform_6, window_bounds = array<i64: 24, 80>}, {transform_indices = @transform_7, window_bounds = array<i64: 8, 64>}, {transform_indices = @transform_8, window_bounds = array<i64: 8, 8>}, {transform_indices = @transform_9, window_bounds = array<i64: 8, 16>}]} {
    %c0 = arith.constant 0 : index
    %c0_0 = arith.constant 0 : index
    %0 = vector.load %arg2[%c0, %c0_0] : memref<8x24xf32, #tpu.memory_space<vmem>>, vector<8x24xf32>
    %c0_1 = arith.constant 0 : index
    %c0_2 = arith.constant 0 : index
    %1 = vector.load %arg5[%c0_1, %c0_2] : memref<24x80xf32, #tpu.memory_space<vmem>>, vector<24x80xf32>
    %cst = arith.constant dense<0.000000e+00> : vector<8x80xf32>
    %2 = tpu.matmul %0, %1, %cst {dimension_numbers = #tpu.dot_dimension_numbers<[1], [0], [0], [1], [0, 0, 1, 1], [], []>} : vector<8x24xf32>, vector<24x80xf32>, vector<8x80xf32> -> vector<8x80xf32>
    %c0_3 = arith.constant 0 : index
    %c0_4 = arith.constant 0 : index
    %3 = vector.load %arg6[%c0_3, %c0_4] : memref<1x80xf32, #tpu.memory_space<vmem>>, vector<1x80xf32>
    %4 = vector.broadcast %3 : vector<1x80xf32> to vector<8x80xf32>
    %5 = arith.addf %2, %4 : vector<8x80xf32>
    %c0_5 = arith.constant 0 : index
    %c0_6 = arith.constant 0 : index
    %c0_7 = arith.constant 0 : index
    %6 = vector.load %arg1[%c0_5, %c0_6, %c0_7] : memref<8x24x32xf32, #tpu.memory_space<vmem>>, vector<8x24x32xf32>
    %7 = vector.shape_cast %6 : vector<8x24x32xf32> to vector<192x32xf32>
    %c0_8 = arith.constant 0 : index
    %c0_9 = arith.constant 0 : index
    %8 = vector.load %arg3[%c0_8, %c0_9] : memref<32x80xf32, #tpu.memory_space<vmem>>, vector<32x80xf32>
    %cst_10 = arith.constant dense<0.000000e+00> : vector<192x80xf32>
    %9 = tpu.matmul %7, %8, %cst_10 {dimension_numbers = #tpu.dot_dimension_numbers<[1], [0], [0], [1], [0, 0, 1, 1], [], []>} : vector<192x32xf32>, vector<32x80xf32>, vector<192x80xf32> -> vector<192x80xf32>
    %10 = vector.shape_cast %9 : vector<192x80xf32> to vector<8x24x80xf32>
    %c0_11 = arith.constant 0 : index
    %c0_12 = arith.constant 0 : index
    %11 = vector.load %arg4[%c0_11, %c0_12] : memref<1x80xf32, #tpu.memory_space<vmem>>, vector<1x80xf32>
    %12 = vector.shape_cast %11 : vector<1x80xf32> to vector<1x1x80xf32>
    %13 = vector.broadcast %12 : vector<1x1x80xf32> to vector<8x24x80xf32>
    %14 = arith.addf %10, %13 : vector<8x24x80xf32>
    %15 = vector.shape_cast %5 : vector<8x80xf32> to vector<8x1x80xf32>
    %16 = vector.broadcast %15 : vector<8x1x80xf32> to vector<8x24x80xf32>
    %17 = arith.addf %14, %16 : vector<8x24x80xf32>
    %cst_13 = arith.constant 0.000000e+00 : f32
    %18 = vector.broadcast %cst_13 : f32 to vector<8x24x80xf32>
    %19 = arith.maximumf %17, %18 : vector<8x24x80xf32>
    %c0_14 = arith.constant 0 : index
    %c0_15 = arith.constant 0 : index
    %20 = vector.load %arg7[%c0_14, %c0_15] : memref<24x80xf32, #tpu.memory_space<vmem>>, vector<24x80xf32>
    %21 = vector.shape_cast %20 : vector<24x80xf32> to vector<1x24x80xf32>
    %22 = vector.broadcast %21 : vector<1x24x80xf32> to vector<8x24x80xf32>
    %23 = arith.mulf %19, %22 : vector<8x24x80xf32>
    %cst_16 = arith.constant dense<0.000000e+00> : vector<8x24xf32>
    %24 = vector.multi_reduction <add>, %23, %cst_16 [2] : vector<8x24x80xf32> to vector<8x24xf32>
    %25 = vector.extract_strided_slice %24 {offsets = [0, 0], sizes = [8, 8], strides = [1, 1]} : vector<8x24xf32> to vector<8x8xf32>
    %cst_17 = arith.constant dense<0xFF800000> : vector<8xf32>
    %26 = vector.multi_reduction <maximumf>, %25, %cst_17 [1] : vector<8x8xf32> to vector<8xf32>
    %27 = vector.shape_cast %26 : vector<8xf32> to vector<8x1xf32>
    %28 = vector.broadcast %27 : vector<8x1xf32> to vector<8x8xf32>
    %29 = arith.subf %25, %28 : vector<8x8xf32>
    %30 = math.exp %29 : vector<8x8xf32>
    %cst_18 = arith.constant dense<0.000000e+00> : vector<8xf32>
    %31 = vector.multi_reduction <add>, %30, %cst_18 [1] : vector<8x8xf32> to vector<8xf32>
    %32 = vector.shape_cast %31 : vector<8xf32> to vector<8x1xf32>
    %33 = vector.broadcast %32 : vector<8x1xf32> to vector<8x8xf32>
    %34 = arith.divf %30, %33 : vector<8x8xf32>
    %35 = vector.extract_strided_slice %24 {offsets = [0, 8], sizes = [8, 16], strides = [1, 1]} : vector<8x24xf32> to vector<8x16xf32>
    %cst_19 = arith.constant dense<0xFF800000> : vector<8xf32>
    %36 = vector.multi_reduction <maximumf>, %35, %cst_19 [1] : vector<8x16xf32> to vector<8xf32>
    %37 = vector.shape_cast %36 : vector<8xf32> to vector<8x1xf32>
    %38 = vector.broadcast %37 : vector<8x1xf32> to vector<8x16xf32>
    %39 = arith.subf %35, %38 : vector<8x16xf32>
    %40 = math.exp %39 : vector<8x16xf32>
    %cst_20 = arith.constant dense<0.000000e+00> : vector<8xf32>
    %41 = vector.multi_reduction <add>, %40, %cst_20 [1] : vector<8x16xf32> to vector<8xf32>
    %42 = vector.shape_cast %41 : vector<8xf32> to vector<8x1xf32>
    %43 = vector.broadcast %42 : vector<8x1xf32> to vector<8x16xf32>
    %44 = arith.divf %40, %43 : vector<8x16xf32>
    %45 = vector.shape_cast %34 : vector<8x8xf32> to vector<8x8x1xf32>
    %46 = vector.extract_strided_slice %6 {offsets = [0, 0, 0], sizes = [8, 8, 32], strides = [1, 1, 1]} : vector<8x24x32xf32> to vector<8x8x32xf32>
    %47 = vector.broadcast %45 : vector<8x8x1xf32> to vector<8x8x32xf32>
    %48 = arith.mulf %47, %46 : vector<8x8x32xf32>
    %cst_21 = arith.constant dense<0.000000e+00> : vector<8x32xf32>
    %49 = vector.multi_reduction <add>, %48, %cst_21 [1] : vector<8x8x32xf32> to vector<8x32xf32>
    %50 = vector.shape_cast %44 : vector<8x16xf32> to vector<8x16x1xf32>
    %51 = vector.extract_strided_slice %6 {offsets = [0, 8, 0], sizes = [8, 16, 32], strides = [1, 1, 1]} : vector<8x24x32xf32> to vector<8x16x32xf32>
    %52 = vector.broadcast %50 : vector<8x16x1xf32> to vector<8x16x32xf32>
    %53 = arith.mulf %52, %51 : vector<8x16x32xf32>
    %cst_22 = arith.constant dense<0.000000e+00> : vector<8x32xf32>
    %54 = vector.multi_reduction <add>, %53, %cst_22 [1] : vector<8x16x32xf32> to vector<8x32xf32>
    %c0_23 = arith.constant 0 : index
    %c0_24 = arith.constant 0 : index
    %55 = vector.load %arg8[%c0_23, %c0_24] : memref<8x64xf32, #tpu.memory_space<vmem>>, vector<8x32xf32>
    tpu.vector_store %arg8[%c0_23, %c0_24], %49 {strides = array<i32>} : memref<8x64xf32, #tpu.memory_space<vmem>>, vector<8x32xf32>,
    %c0_25 = arith.constant 0 : index
    %c32 = arith.constant 32 : index
    %56 = vector.load %arg8[%c0_25, %c32] : memref<8x64xf32, #tpu.memory_space<vmem>>, vector<8x32xf32>
    tpu.vector_store %arg8[%c0_25, %c32], %54 {strides = array<i32>} : memref<8x64xf32, #tpu.memory_space<vmem>>, vector<8x32xf32>,
    %c0_26 = arith.constant 0 : index
    %c0_27 = arith.constant 0 : index
    %57 = vector.load %arg9[%c0_26, %c0_27] : memref<8x8xf32, #tpu.memory_space<vmem>>, vector<8x8xf32>
    tpu.vector_store %arg9[%c0_26, %c0_27], %34 {strides = array<i32>} : memref<8x8xf32, #tpu.memory_space<vmem>>, vector<8x8xf32>,
    %c0_28 = arith.constant 0 : index
    %c0_29 = arith.constant 0 : index
    %58 = vector.load %arg10[%c0_28, %c0_29] : memref<8x16xf32, #tpu.memory_space<vmem>>, vector<8x16xf32>
    tpu.vector_store %arg10[%c0_28, %c0_29], %44 {strides = array<i32>} : memref<8x16xf32, #tpu.memory_space<vmem>>, vector<8x16xf32>,
    return
  }
  func.func @transform_0(%arg0: i32) -> (i32, i32, i32) {
    %c0_i32 = arith.constant 0 : i32
    %c0_i32_0 = arith.constant 0 : i32
    %c0_i32_1 = arith.constant 0 : i32
    return %arg0, %c0_i32, %c0_i32_0 : i32, i32, i32
  }
  func.func @transform_1(%arg0: i32) -> (i32, i32) {
    %c0_i32 = arith.constant 0 : i32
    %c0_i32_0 = arith.constant 0 : i32
    return %arg0, %c0_i32 : i32, i32
  }
  func.func @transform_2(%arg0: i32) -> (i32, i32) {
    %c0_i32 = arith.constant 0 : i32
    %c0_i32_0 = arith.constant 0 : i32
    %c0_i32_1 = arith.constant 0 : i32
    return %c0_i32, %c0_i32_0 : i32, i32
  }
  func.func @transform_3(%arg0: i32) -> (i32, i32) {
    %c0_i32 = arith.constant 0 : i32
    %c0_i32_0 = arith.constant 0 : i32
    %c0_i32_1 = arith.constant 0 : i32
    return %c0_i32, %c0_i32_0 : i32, i32
  }
  func.func @transform_4(%arg0: i32) -> (i32, i32) {
    %c0_i32 = arith.constant 0 : i32
    %c0_i32_0 = arith.constant 0 : i32
    %c0_i32_1 = arith.constant 0 : i32
    return %c0_i32, %c0_i32_0 : i32, i32
  }
  func.func @transform_5(%arg0: i32) -> (i32, i32) {
    %c0_i32 = arith.constant 0 : i32
    %c0_i32_0 = arith.constant 0 : i32
    %c0_i32_1 = arith.constant 0 : i32
    return %c0_i32, %c0_i32_0 : i32, i32
  }
  func.func @transform_6(%arg0: i32) -> (i32, i32) {
    %c0_i32 = arith.constant 0 : i32
    %c0_i32_0 = arith.constant 0 : i32
    %c0_i32_1 = arith.constant 0 : i32
    return %c0_i32, %c0_i32_0 : i32, i32
  }
  func.func @transform_7(%arg0: i32) -> (i32, i32) {
    %c0_i32 = arith.constant 0 : i32
    %c0_i32_0 = arith.constant 0 : i32
    return %arg0, %c0_i32 : i32, i32
  }
  func.func @transform_8(%arg0: i32) -> (i32, i32) {
    %c0_i32 = arith.constant 0 : i32
    %c0_i32_0 = arith.constant 0 : i32
    return %arg0, %c0_i32 : i32, i32
  }
  func.func @transform_9(%arg0: i32) -> (i32, i32) {
    %c0_i32 = arith.constant 0 : i32
    %c0_i32_0 = arith.constant 0 : i32
    return %arg0, %c0_i32 : i32, i32
  }
}

</mosaic_0001>

<bundles_post_ra>
// kernel: tpu_custom_call.1
= control target key start
LH: loop header
LB: loop body
LE: loop exit
PB: predicated region body
PF: predicated region fallthrough
CT: control target
= control target key end

     0   :  { %15 = vsyncpa [#allocation3], 0  ;;  %s3123_s0 = inlined_call_operand.hbm [shape: f32[8,24,32], index: 0, kind: input, shape index: {}]   ;;  %s3124_s1 = inlined_call_operand.hbm [shape: f32[8,24], index: 1, kind: input, shape index: {}]   ;;  %s3125_s2 = inlined_call_operand.hbm [shape: f32[32,80], index: 2, kind: input, shape index: {}]   ;;  %s3126_s3 = inlined_call_operand.vmem [shape: f32[1,80], index: 3, kind: input, shape index: {}]   ;;  %s3127_s4 = inlined_call_operand.hbm [shape: f32[24,80], index: 4, kind: input, shape index: {}]   ;;  %s3128_s5 = inlined_call_operand.vmem [shape: f32[1,80], index: 5, kind: input, shape index: {}]   ;;  %s3129_s6 = inlined_call_operand.hbm [shape: f32[24,80], index: 6, kind: input, shape index: {}]   ;;  %s3130_s7 = inlined_call_operand.hbm [shape: f32[8,64], index: 7, kind: output, shape index: {0}]   ;;  %s3131_s8 = inlined_call_operand.hbm [shape: f32[8,8], index: 8, kind: output, shape index: {1}]   ;;  %s3132_s9 = inlined_call_operand.hbm [shape: f32[8,16], index: 9, kind: output, shape index: {2}]  }
   0x1   :  { %16 = vsyncpa [#allocation6], 0 }
   0x2   :  { %17 = vsyncpa [#allocation9], 0 }
   0x3   :  { %18 = vsyncpa [#allocation4], 0 }
   0x4   :  { %19 = vsyncpa [#allocation13], 0  ;;  %s2308_s30 = smov [#allocation5]   ;;  %s2122_s13 = scalar_lea.hbm %s3124_s1, 128 }
   0x5   :  { %s38_s10 = sshll.u32 %s2308_s30, 4  ;;  %p2123_p0 = scmp.ne.s32.totalorder %s3124_s1, %s2122_s13  ;;  %s39_s10 = int_to_ptr.vmem [resolvable:$true] %s38_s10 }
   0x6   :  { %p2126_p1 = scmp.lt.u32.totalorder %s2122_s13, %s3124_s1 }
   0x8   :  { %p2128_p2 = pnand %p2126_p1, %p2123_p0 }
   0xa   :  { %2131 = shalt.err (!%p2128_p2)
}
   0xb   :  { %s2132_s18 = scalar_lea.vmem %s39_s10, 128  ;;  %p2137_p4 = scmp.lt.s32.totalorder %s39_s10, %s39_s10 }
   0xc   :  { %p2133_p3 = scmp.ne.s32.totalorder %s39_s10, %s2132_s18  ;;  %p2138_p5 = scmp.lt.s32.totalorder %s2132_s18, %s2132_s18 }
   0xe   :  { %p2139_p6 = por %p2138_p5, %p2137_p4 }
  0x10   :  { %p2140_p7 = pnand %p2139_p6, %p2133_p3 }
  0x12   :  { %2143 = shalt.err (!%p2140_p7)
}
  0x13   :  { %41 = dma.hbm_to_vmem [thread:$0]  %s3124_s1, 128, %s39_s10, [#allocation6]  }
  0x14   :  { %s2309_s21 = smov [#allocation8]   ;;  %s2310_s23 = smov [#allocation2]  }
  0x15   :  { %s61_s22 = sshll.u32 %s2309_s21, 4  ;;  %s25_s24 = sshll.u32 %s2310_s23, 4  ;;  %s62_s22 = int_to_ptr.vmem [resolvable:$true] %s61_s22  ;;  %s26_s24 = int_to_ptr.vmem [resolvable:$true] %s25_s24 }
  0x16   :  { %s2144_s27 = scalar_lea.hbm %s3127_s4, 384 }
  0x17   :  { %p2145_p8 = scmp.ne.s32.totalorder %s3127_s4, %s2144_s27  ;;  %p2148_p9 = scmp.lt.u32.totalorder %s2144_s27, %s3127_s4 }
  0x19   :  { %p2150_p10 = pnand %p2148_p9, %p2145_p8 }
  0x1b   :  { %2153 = shalt.err (!%p2150_p10)
}
  0x1c   :  { %s2154_s1 = scalar_lea.vmem %s62_s22, 384  ;;  %p2159_p12 = scmp.lt.s32.totalorder %s62_s22, %s62_s22 }
  0x1d   :  { %p2155_p11 = scmp.ne.s32.totalorder %s62_s22, %s2154_s1  ;;  %p2160_p13 = scmp.lt.s32.totalorder %s2154_s1, %s2154_s1 }
  0x1f   :  { %p2161_p0 = por %p2160_p13, %p2159_p12 }
  0x21   :  { %p2162_p1 = pnand %p2161_p0, %p2155_p11 }
  0x23   :  { %2165 = shalt.err (!%p2162_p1)
}
  0x24   :  { %s2311_s10 = smov 128   ;;  %s2312_s12 = smov 8  }
  0x25   :  { %67 = dma.hbm_to_vmem [thread:$0]  %s3127_s4, 384, %s62_s22, [#allocation9], %s2311_s10, %s2311_s10, %s2312_s12  }
  0x26   :  { %s2166_s17 = scalar_lea.hbm %s3123_s0, 3072 }
  0x27   :  { %p2167_p2 = scmp.ne.s32.totalorder %s3123_s0, %s2166_s17  ;;  %p2170_p3 = scmp.lt.u32.totalorder %s2166_s17, %s3123_s0 }
  0x29   :  { %p2172_p4 = pnand %p2170_p3, %p2167_p2 }
  0x2b   :  { %2175 = shalt.err (!%p2172_p4)
}
  0x2c   :  { %s2176_s23 = scalar_lea.vmem %s26_s24, 3072  ;;  %p2181_p6 = scmp.lt.s32.totalorder %s26_s24, %s26_s24 }
  0x2d   :  { %p2177_p5 = scmp.ne.s32.totalorder %s26_s24, %s2176_s23  ;;  %p2182_p7 = scmp.lt.s32.totalorder %s2176_s23, %s2176_s23 }
  0x2f   :  { %p2183_p8 = por %p2182_p7, %p2181_p6 }
  0x31   :  { %p2184_p9 = pnand %p2183_p8, %p2177_p5 }
  0x33   :  { %2187 = shalt.err (!%p2184_p9)
}
  0x34   :  { %31 = dma.hbm_to_vmem [thread:$0]  %s3123_s0, 3072, %s26_s24, [#allocation3], %s2311_s10, %s2311_s10, %s2312_s12  }
  0x35   :  { %s2313_s25 = smov [#allocation7]   ;;  %s2314_s27 = smov [#allocation10]  }
  0x36   :  { %s47_s26 = sshll.u32 %s2313_s25, 4  ;;  %s75_s28 = sshll.u32 %s2314_s27, 4  ;;  %s48_s26 = int_to_ptr.vmem [resolvable:$true] %s47_s26  ;;  %s76_s28 = int_to_ptr.vmem [resolvable:$true] %s75_s28 }
  0x37   :  { %s2188_s11 = scalar_lea.hbm %s3125_s2, 512 }
  0x38   :  { %p2189_p10 = scmp.ne.s32.totalorder %s3125_s2, %s2188_s11  ;;  %p2192_p11 = scmp.lt.u32.totalorder %s2188_s11, %s3125_s2 }
  0x3a   :  { %p2194_p12 = pnand %p2192_p11, %p2189_p10 }
  0x3c   :  { %2197 = shalt.err (!%p2194_p12)
}
  0x3d   :  { %s2198_s0 = scalar_lea.vmem %s48_s26, 512  ;;  %p2203_p0 = scmp.lt.s32.totalorder %s48_s26, %s48_s26 }
  0x3e   :  { %p2199_p13 = scmp.ne.s32.totalorder %s48_s26, %s2198_s0  ;;  %p2204_p1 = scmp.lt.s32.totalorder %s2198_s0, %s2198_s0 }
  0x40   :  { %p2205_p2 = por %p2204_p1, %p2203_p0 }
  0x42   :  { %p2206_p3 = pnand %p2205_p2, %p2199_p13 }
  0x44   :  { %2209 = shalt.err (!%p2206_p3)
}
  0x45   :  { %53 = dma.hbm_to_vmem [thread:$0]  %s3125_s2, 512, %s48_s26, [#allocation6], %s2311_s10, %s2311_s10, %s2312_s12  }
  0x46   :  { %s2210_s19 = scalar_lea.hbm %s3129_s6, 384 }
  0x47   :  { %p2211_p4 = scmp.ne.s32.totalorder %s3129_s6, %s2210_s19  ;;  %p2214_p5 = scmp.lt.u32.totalorder %s2210_s19, %s3129_s6 }
  0x49   :  { %p2216_p6 = pnand %p2214_p5, %p2211_p4 }
  0x4b   :  { %2219 = shalt.err (!%p2216_p6)
}
  0x4c   :  { %s2220_s22 = scalar_lea.vmem %s76_s28, 384  ;;  %p2225_p8 = scmp.lt.s32.totalorder %s76_s28, %s76_s28 }
  0x4d   :  { %p2221_p7 = scmp.ne.s32.totalorder %s76_s28, %s2220_s22  ;;  %p2226_p9 = scmp.lt.s32.totalorder %s2220_s22, %s2220_s22 }
  0x4f   :  { %p2227_p10 = por %p2226_p9, %p2225_p8 }
  0x51   :  { %p2228_p11 = pnand %p2227_p10, %p2221_p7 }
  0x53   :  { %2231 = shalt.err (!%p2228_p11)
}
  0x54   :  { %81 = dma.hbm_to_vmem [thread:$0]  %s3129_s6, 384, %s76_s28, [#allocation9], %s2311_s10, %s2311_s10, %s2312_s12  }
  0x55   :  { %2298 = dma.done.wait [#allocation3], 3072  }
  0x56   :  { %2299 = vsyncadd [#allocation3], 4294964224 }
  0x57   :  { %2300 = dma.done.wait [#allocation6], 640  }
  0x58   :  { %2301 = vsyncadd [#allocation6], 4294966656 }
  0x59   :  { %2302 = dma.done.wait [#allocation9], 768  }
  0x5a   :  { %2303 = vsyncadd [#allocation9], 4294966528  ;;  %v2315_v0 = vmov 0.0|0.0   ;;  %vm2316_vm0 = vmmov 0   ;;  %v2317_v1 = vmov 0.0   ;;  %v98_v2 = vld [vmem:[#allocation8] sm:$0xff]  ;;  %v504_v39 = vlaneseq }
  0x5b   :  { %1985 = vmatprep.subr.bf16.mxu0 %v2315_v0  ;;  %1938 = vmatprep.mubr.msk.f32.mxu0 %vm2316_vm0, %v2317_v1  ;;  %v99_v3 = vld [vmem:[#allocation8 + $0x8] sm:$0xff]  ;;  %v206_v4 = vld [vmem:[#allocation7] sm:$0xff]  ;;  %vm210_vm1 = vcmask 261120   ;;  %v208_v7 = vld [vmem:[#allocation7 + $0x10] sm:$0xff]  ;;  %vm108_vm2 = vcmask 195584   ;;  %vm664_vm3 = vcmask 654336  }
  0x5c   :  { %v1986_v5 = vpack.c.bf16 %v99_v3, %v98_v2  ;;  %v207_v6 = vld [vmem:[#allocation7 + $0x8] sm:$0xff]  ;;  %v209_v9 = vld [vmem:[#allocation7 + $0x18] sm:$0xff]  ;;  %v100_v12 = vld [vmem:[#allocation8 + $0x10] sm:$0xff]  ;;  %v2318_v37 = vmov 1966171168   ;;  %v2471_v41 = vshrl.u32 %v504_v39, 7 }
  0x5d   :  { %v1988_v8 = vpack.c.bf16 %v207_v6, %v206_v4  ;;  %v192_v10 = vld [vmem:[#allocation2 + $0x50] sm:$0xff]  ;;  %v1992_v11 = vpack.c.bf16 %v209_v9, %v208_v7  ;;  %v97_v13 = vld [vmem:[#allocation5] sm:$0xff]  ;;  %v193_v15 = vld [vmem:[#allocation2 + $0x58] sm:$0xff]  ;;  %v502_v38 = vunpack.c.l.s4 %v2318_v37  ;;  %vm1020_vm4 = vcmask 130112   ;;  %s2321_s27 = smov [#allocation14]   ;;  %s2322_s29 = smov 32  }
  0x5e   :  { %1987 = vmatpush3.bf16.msra.mxu0 %v1986_v5  ;;  %1964 = vmatprep.mubr.msk.f32.mxu1 %vm210_vm1, %v192_v10  ;;  %v182_v14 = vld [vmem:[#allocation2] sm:$0xff]  ;;  %v195_v17 = vld [vmem:[#allocation2 + $0x68] sm:$0xff]  ;;  %v196_v19 = vld [vmem:[#allocation2 + $0x70] sm:$0xff]  ;;  %v2480_v53 = vsub.s32 0, %v2471_v41  ;;  %vm779_vm5 = vcmask 1041409   ;;  %vm781_vm6 = vcmask 1042434  }
  0x5f   :  { %1996 = vmatprep.subr.bf16.mxu1 %v1988_v8  ;;  %1936 = vmatprep.subr.mxu0 %v2317_v1  ;;  %v194_v16 = vld [vmem:[#allocation2 + $0x60] sm:$0xff]  ;;  %v183_v18 = vld [vmem:[#allocation2 + $0x8] sm:$0xff]  ;;  %v184_v20 = vld [vmem:[#allocation2 + $0x10] sm:$0xff]  ;;  %v503_v40 = vunpack.c.0.s8 %v502_v38  ;;  %vm783_vm7 = vcmask 1043459   ;;  %vm785_vm8 = vcmask 1044484   ;;  %vm787_vm9 = vcmask 1045509  }
  0x60   :  { %1998 = vmatpush3.bf16.msra.mxu1 %v1988_v8  ;;  %v197_v21 = vld [vmem:[#allocation2 + $0x78] sm:$0xff]  ;;  %v198_v23 = vld [vmem:[#allocation2 + $0x80] sm:$0xff]  ;;  %v199_v25 = vld [vmem:[#allocation2 + $0x88] sm:$0xff]  ;;  %vm789_vm10 = vcmask 1046534   ;;  %vm791_vm11 = vcmask 1047559   ;;  %vm1093_vm12 = vcmask 130048  }
  0x61   :  { %1997 = vmatprep.subr.bf16.mxu1 %v1992_v11  ;;  %v185_v22 = vld [vmem:[#allocation2 + $0x18] sm:$0xff]  ;;  %v186_v24 = vld [vmem:[#allocation2 + $0x20] sm:$0xff]  ;;  %v187_v26 = vld [vmem:[#allocation2 + $0x28] sm:$0xff]  ;;  %v506_v43 = vsub.s32 %v503_v40, %v2471_v41  ;;  %vm794_vm13 = vcmask 64512   ;;  %s1855_s28 = sshll.u32 %s2321_s27, 4  ;;  %s3073_s28 = int_to_ptr.vmem [resolvable:$true] %s1855_s28 }
  0x62   :  { %1937 = vmatpush3.msra.mxu0 %v100_v12  ;;  %v200_v27 = vld [vmem:[#allocation2 + $0x90] sm:$0xff]  ;;  %v201_v29 = vld [vmem:[#allocation2 + $0x98] sm:$0xff]  ;;  %v202_v31 = vld [vmem:[#allocation2 + $0xa0] sm:$0xff] }
  0x63   :  { %1939 = vmatmul.mubr.msk.f32.vlgmr.msra.gmra.mrb[0].mxu0 %vm108_vm2, %v97_v13  ;;  %1989 = vmatprep.subr.bf16.mxu0 %v1988_v8  ;;  %v188_v28 = vld [vmem:[#allocation2 + $0x30] sm:$0xff]  ;;  %v189_v30 = vld [vmem:[#allocation2 + $0x38] sm:$0xff]  ;;  %v190_v32 = vld [vmem:[#allocation2 + $0x40] sm:$0xff] }
  0x64   :  { %1999 = vmatpush3.bf16.msra.mxu1 %v1992_v11  ;;  %1991 = vmatpush3.bf16.msra.mxu0 %v1988_v8  ;;  %v203_v33 = vld [vmem:[#allocation2 + $0xa8] sm:$0xff]  ;;  %v204_v35 = vld [vmem:[#allocation2 + $0xb0] sm:$0xff]  ;;  %v205_v36 = vld [vmem:[#allocation2 + $0xb8] sm:$0xff] }
  0x65   :  { %1993 = vmatprep.subr.bf16.mxu0 %v1992_v11  ;;  %1949 = vmatprep.mubr.msk.f32.mxu0 %vm210_vm1, %v182_v14  ;;  %v191_v34 = vld [vmem:[#allocation2 + $0x48] sm:$0xff]  ;;  %v1873_v42 = vld [vmem:[%s3128_s5] ss:$0 sm:$0xff] }
  0x66   :  { %v2485_v54 = vld [vmem:[%s3126_s3] ss:$0 sm:$0xff]  ;;  %s2320_s3 = smov [#allocation12]  }
  0x67   :  { %1965 = vmatmul.mubr.msk.f32.vlgmr.msra.gmra.mrb[0].mxu1 %vm210_vm1, %v193_v15  ;;  %s1845_s5 = sshll.u32 %s2320_s3, 4  ;;  %s1846_s5 = int_to_ptr.vmem [resolvable:$true] %s1845_s5 }
  0x68   :  { %1995 = vmatpush3.bf16.msra.mxu0 %v1992_v11  ;;  %1967 = vmatprep.mubr.msk.f32.mxu1 %vm210_vm1, %v194_v16  ;;  %s2232_s30 = scalar_lea.vmem %s1846_s5, 128  ;;  %p2237_p13 = scmp.lt.s32.totalorder %s1846_s5, %s1846_s5 }
  0x69   :  { %p2233_p12 = scmp.ne.s32.totalorder %s1846_s5, %s2232_s30  ;;  %p2238_p0 = scmp.lt.s32.totalorder %s2232_s30, %s2232_s30 }
  0x6b   :  { %1968 = vmatmul.mubr.msk.f32.gmra.mrb[2].mxu1 %vm210_vm1, %v195_v17  ;;  %1950 = vmatmul.mubr.msk.f32.vlgmr.msra.gmra.mrb[2].mxu0 %vm210_vm1, %v183_v18  ;;  %p2239_p1 = por %p2238_p0, %p2237_p13 }
  0x6c   :  { %1970 = vmatprep.mubr.msk.f32.mxu1 %vm210_vm1, %v196_v19  ;;  %1952 = vmatprep.mubr.msk.f32.mxu0 %vm210_vm1, %v184_v20 }
  0x6d   :  { %p2240_p2 = pnand %p2239_p1, %p2233_p12 }
  0x6f   :  { %1971 = vmatmul.mubr.msk.f32.gmra.mrb[4].mxu1 %vm210_vm1, %v197_v21  ;;  %1953 = vmatmul.mubr.msk.f32.gmra.mrb[4].mxu0 %vm210_vm1, %v185_v22 }
  0x70   :  { %1973 = vmatprep.mubr.msk.f32.mxu1 %vm210_vm1, %v198_v23  ;;  %1955 = vmatprep.mubr.msk.f32.mxu0 %vm210_vm1, %v186_v24  ;;  %v2515_v24 = vld [vmem:[#allocation10 + $0x8] sm:$0xff] }
  0x73   :  { %1974 = vmatmul.mubr.msk.f32.gmra.mrb[6].mxu1 %vm210_vm1, %v199_v25  ;;  %1956 = vmatmul.mubr.msk.f32.gmra.mrb[6].mxu0 %vm210_vm1, %v187_v26 }
  0x74   :  { %1976 = vmatprep.mubr.msk.f32.mxu1 %vm210_vm1, %v200_v27  ;;  %1958 = vmatprep.mubr.msk.f32.mxu0 %vm210_vm1, %v188_v28 }
  0x77   :  { %1977 = vmatmul.mubr.msk.f32.gmra.mrb[8].mxu1 %vm210_vm1, %v201_v29  ;;  %1959 = vmatmul.mubr.msk.f32.gmra.mrb[8].mxu0 %vm210_vm1, %v189_v30 }
  0x78   :  { %1979 = vmatprep.mubr.msk.f32.mxu1 %vm210_vm1, %v202_v31  ;;  %1961 = vmatprep.mubr.msk.f32.mxu0 %vm210_vm1, %v190_v32 }
  0x7b   :  { %1980 = vmatmul.mubr.msk.f32.gmra.mrb[10].mxu1 %vm210_vm1, %v203_v33  ;;  %1962 = vmatmul.mubr.msk.f32.gmra.mrb[10].mxu0 %vm210_vm1, %v191_v34 }
  0x7c   :  { %1982 = vmatprep.mubr.msk.f32.mxu1 %vm210_vm1, %v204_v35  ;;  %v2526_v35 = vld [vmem:[#allocation10 + $0x10] sm:$0xff] }
  0x7f   :  { %1983 = vmatmul.mubr.msk.f32.gmra.mrb[12].mxu1 %vm210_vm1, %v205_v36 }
 0x136   :  { %v178_v44 = vpop.f32.mrb[0].mxu0 }
 0x137   :  { %v179_v45 = vadd.f32 %v1873_v42, %v178_v44  ;;  %v1940_v46 = vpop.f32.mrb[1].mxu0 }
 0x139   :  { %v500_v47 = vcombine.high %v179_v45, %v179_v45  ;;  %v507_v48 = vrot.slane %v179_v45, %v506_v43 }
 0x13a   :  { %v1966_v49 = vpop.f32.mrb[0].mxu1 }
 0x13b   :  { %v514_v50 = vrot.slane %v500_v47, %v506_v43  ;;  %v515_v51 = vcombine.high %v507_v48, %v507_v48  ;;  %v2477_v52 = vrot.slane %v507_v48, %v506_v43  ;;  %v399_v55 = vpop.f32.mrb[1].mxu1  ;;  %v486_v59 = vadd.f32 %v1966_v49, %v2485_v54 }
 0x13c   :  { %v485_v9 = vadd.f32 %v2485_v54, %v399_v55 }
 0x13d   :  { %v516_v56 = vcombine.high %v514_v50, %v514_v50  ;;  %v2487_v57 = vrot.slane %v514_v50, %v506_v43  ;;  %v537_v58 = vrot.slane %v515_v51, %v506_v43  ;;  %v552_v0 = vrot.slane %v2477_v52, %v2480_v53 }
 0x13e   :  { %v1969_v60 = vpop.f32.mrb[2].mxu1  ;;  %v1951_v61 = vpop.f32.mrb[2].mxu0  ;;  %v545_v29 = vcombine.high %v2477_v52, %v2477_v52 }
 0x13f   :  { %v2490_v62 = vrot.slane %v516_v56, %v506_v43  ;;  %v547_v63 = vcombine.high %v537_v58, %v537_v58  ;;  %v488_v1 = vadd.f32 %v1969_v60, %v2485_v54  ;;  %v409_v2 = vpop.f32.mrb[3].mxu1  ;;  %v349_v3 = vpop.f32.mrb[3].mxu0  ;;  %v568_v4 = vrot.slane %v2487_v57, %v2480_v53 }
 0x140   :  { %v476_v5 = vadd.f32 %v1951_v61, %v2485_v54  ;;  %v487_v6 = vadd.f32 %v2485_v54, %v409_v2  ;;  %v475_v7 = vadd.f32 %v2485_v54, %v349_v3  ;;  %v556_v11 = vrot.slane %v537_v58, %v2480_v53 }
 0x141   :  { %v2501_v8 = vrot.slane %v547_v63, %v2480_v53  ;;  %v572_v10 = vrot.slane %v2490_v62, %v2480_v53  ;;  %v602_v12 = vadd.f32 %v568_v4, %v488_v1  ;;  %v546_v36 = vcombine.high %v2487_v57, %v2487_v57 }
 0x142   :  { %v590_v13 = vadd.f32 %v552_v0, %v476_v5  ;;  %v2507_v14 = vadd.f32 %v568_v4, %v487_v6  ;;  %v2509_v15 = vadd.f32 %v552_v0, %v475_v7  ;;  %v1972_v16 = vpop.f32.mrb[4].mxu1  ;;  %v1954_v17 = vpop.f32.mrb[4].mxu0  ;;  %v560_v5 = vrot.slane %v545_v29, %v2480_v53 }
 0x143   :  { %v600_v18 = vadd.f32 %v2501_v8, %v486_v59  ;;  %v599_v19 = vadd.f32 %v2501_v8, %v485_v9  ;;  %v490_v20 = vadd.f32 %v1972_v16, %v2485_v54  ;;  %v478_v21 = vadd.f32 %v1954_v17, %v2485_v54  ;;  %v419_v22 = vpop.f32.mrb[5].mxu1  ;;  %v359_v23 = vpop.f32.mrb[5].mxu0 }
 0x144   :  { %v614_v25 = vmax.f32 %v590_v13, 0.0  ;;  %v489_v30 = vadd.f32 %v2485_v54, %v419_v22  ;;  %v477_v31 = vadd.f32 %v2485_v54, %v359_v23  ;;  %v626_v37 = vmax.f32 %v602_v12, 0.0 }
 0x145   :  { %v624_v26 = vmax.f32 %v600_v18, 0.0  ;;  %v2517_v27 = vadd.f32 %v572_v10, %v490_v20  ;;  %v2519_v28 = vadd.f32 %v556_v11, %v478_v21  ;;  %v623_v52 = vmax.f32 %v599_v19, 0.0 }
 0x146   :  { %v1975_v32 = vpop.f32.mrb[6].mxu1  ;;  %v1957_v33 = vpop.f32.mrb[6].mxu0  ;;  %v641_v34 = vmul.f32 %v2515_v24, %v614_v25  ;;  %v603_v44 = vadd.f32 %v568_v4, %v489_v30  ;;  %v591_v45 = vadd.f32 %v552_v0, %v477_v31  ;;  %v576_v61 = vrot.slane %v546_v36, %v2480_v53 }
 0x147   :  { %v492_v38 = vadd.f32 %v1975_v32, %v2485_v54  ;;  %v480_v40 = vadd.f32 %v1957_v33, %v2485_v54  ;;  %v429_v42 = vpop.f32.mrb[7].mxu1  ;;  %v369_v43 = vpop.f32.mrb[7].mxu0  ;;  %v651_v51 = vmul.f32 %v2526_v35, %v624_v26  ;;  %v653_v9 = vmul.f32 %v2515_v24, %v626_v37 }
 0x148   :  { %v491_v46 = vadd.f32 %v2485_v54, %v429_v42  ;;  %v479_v47 = vadd.f32 %v2485_v54, %v369_v43  ;;  %v668_v50 = vsel %vm664_vm3, %v641_v34, 0.0  ;;  %v627_v55 = vmax.f32 %v603_v44, 0.0 }
 0x149   :  { %v606_v48 = vadd.f32 %v572_v10, %v492_v38  ;;  %v2534_v49 = vadd.f32 %v556_v11, %v480_v40  ;;  %669 = vadd.xlane.f32.xlu0 %v668_v50  ;;  %v698_v0 = vsel %vm664_vm3, %v651_v51, 0.0  ;;  %v650_v18 = vmul.f32 %v2515_v24, %v623_v52 }
 0x14a   :  { %v605_v56 = vadd.f32 %v572_v10, %v491_v46  ;;  %v2538_v57 = vadd.f32 %v556_v11, %v479_v47  ;;  %v1978_v58 = vpop.f32.mrb[8].mxu1  ;;  %v1960_v59 = vpop.f32.mrb[8].mxu0  ;;  %699 = vadd.xlane.f32.xlu1 %v698_v0  ;;  %v548_v10 = vcombine.high %v2490_v62, %v2490_v62  ;;  %v654_v16 = vmul.f32 %v2526_v35, %v627_v55 }
 0x14b   :  { %v494_v60 = vadd.f32 %v1978_v58, %v2485_v54  ;;  %v439_v63 = vpop.f32.mrb[9].mxu1  ;;  %v379_v1 = vpop.f32.mrb[9].mxu0  ;;  %v630_v2 = vmax.f32 %v606_v48, 0.0  ;;  %v482_v4 = vadd.f32 %v1960_v59, %v2485_v54  ;;  %v615_v19 = vmax.f32 %v591_v45, 0.0 }
 0x14c   :  { %v493_v3 = vadd.f32 %v2485_v54, %v439_v63  ;;  %v481_v7 = vadd.f32 %v2485_v54, %v379_v1  ;;  %v704_v21 = vsel %vm664_vm3, %v653_v9, 0.0  ;;  %v618_v62 = vmax.f32 %v2534_v49, 0.0 }
 0x14d   :  { %v608_v6 = vadd.f32 %v576_v61, %v494_v60  ;;  %v596_v12 = vadd.f32 %v560_v5, %v482_v4  ;;  %705 = vadd.xlane.f32.xlu0 %v704_v21  ;;  %v580_v26 = vrot.slane %v548_v10, %v2480_v53  ;;  %v629_v30 = vmax.f32 %v605_v56, 0.0 }
 0x14e   :  { %v2550_v11 = vadd.f32 %v576_v61, %v493_v3  ;;  %v1981_v13 = vpop.f32.mrb[10].mxu1  ;;  %v1963_v17 = vpop.f32.mrb[10].mxu0  ;;  %v2554_v20 = vadd.f32 %v560_v5, %v481_v7  ;;  %v707_v31 = vsel %vm664_vm3, %v654_v16, 0.0  ;;  %v695_v37 = vsel %vm664_vm3, %v650_v18, 0.0 }
 0x14f   :  { %v496_v22 = vadd.f32 %v1981_v13, %v2485_v54  ;;  %v449_v23 = vpop.f32.mrb[11].mxu1  ;;  %v389_v25 = vpop.f32.mrb[11].mxu0  ;;  %v484_v32 = vadd.f32 %v1963_v17, %v2485_v54  ;;  %708 = vadd.xlane.f32.xlu1 %v707_v31  ;;  %v657_v40 = vmul.f32 %v2526_v35, %v630_v2  ;;  %v642_v46 = vmul.f32 %v2526_v35, %v615_v19  ;;  %v637_v13 = vld [vmem:[#allocation10] sm:$0xff] }
 0x150   :  { %v495_v29 = vadd.f32 %v2485_v54, %v449_v23  ;;  %v483_v33 = vadd.f32 %v2485_v54, %v389_v25  ;;  %v617_v48 = vmax.f32 %v2538_v57, 0.0  ;;  %v645_v52 = vmul.f32 %v2526_v35, %v618_v62 }
 0x151   :  { %v2564_v34 = vadd.f32 %v580_v26, %v496_v22  ;;  %v598_v42 = vadd.f32 %v2501_v8, %v484_v32  ;;  %696 = vadd.xlane.f32.xlu0 %v695_v37  ;;  %v716_v50 = vsel %vm664_vm3, %v657_v40, 0.0  ;;  %v620_v55 = vmax.f32 %v596_v12, 0.0 }
 0x152   :  { %v609_v36 = vadd.f32 %v576_v61, %v495_v29  ;;  %v1984_v38 = vpop.f32.mrb[12].mxu1  ;;  %v597_v43 = vadd.f32 %v560_v5, %v483_v33  ;;  %v671_v8 = vsel %vm664_vm3, %v642_v46, 0.0  ;;  %v656_v56 = vmul.f32 %v2515_v24, %v629_v30 }
 0x153   :  { %v498_v44 = vadd.f32 %v1984_v38, %v2485_v54  ;;  %v459_v45 = vpop.f32.mrb[13].mxu1  ;;  %717 = vadd.xlane.f32.xlu1 %v716_v50  ;;  %v680_v59 = vsel %vm664_vm3, %v645_v52, 0.0  ;;  %v632_v57 = vmax.f32 %v608_v6, 0.0  ;;  %v647_v61 = vmul.f32 %v2515_v24, %v620_v55 }
 0x154   :  { %v497_v47 = vadd.f32 %v2485_v54, %v459_v45  ;;  %v621_v58 = vmax.f32 %v597_v43, 0.0  ;;  %v644_v54 = vmul.f32 %v2515_v24, %v617_v48  ;;  %v713_v60 = vsel %vm664_vm3, %v656_v56, 0.0 }
 0x155   :  { %v612_v49 = vadd.f32 %v580_v26, %v498_v44  ;;  %672 = vadd.xlane.f32.xlu0 %v671_v8  ;;  %v633_v63 = vmax.f32 %v609_v36, 0.0  ;;  %v686_v3 = vsel %vm664_vm3, %v647_v61, 0.0  ;;  %v659_v4 = vmul.f32 %v2515_v24, %v632_v57 }
 0x156   :  { %v611_v51 = vadd.f32 %v580_v26, %v497_v47  ;;  %v677_v0 = vsel %vm664_vm3, %v644_v54, 0.0  ;;  %v648_v1 = vmul.f32 %v2526_v35, %v621_v58  ;;  %v613_v9 = vmax.f32 %v2509_v15, 0.0 }
 0x157   :  { %681 = vadd.xlane.f32.xlu1 %v680_v59  ;;  %v636_v5 = vmax.f32 %v612_v49, 0.0  ;;  %v660_v7 = vmul.f32 %v2526_v35, %v633_v63  ;;  %v722_v10 = vsel %vm664_vm3, %v659_v4, 0.0  ;;  %v616_v16 = vmax.f32 %v2519_v28, 0.0 }
 0x158   :  { %v635_v2 = vmax.f32 %v611_v51, 0.0  ;;  %v689_v6 = vsel %vm664_vm3, %v648_v1, 0.0  ;;  %v619_v19 = vmax.f32 %v2554_v20, 0.0  ;;  %v640_v22 = vmul.f32 %v637_v13, %v613_v9 }
 0x159   :  { %714 = vadd.xlane.f32.xlu0 %v713_v60  ;;  %v725_v17 = vsel %vm664_vm3, %v660_v7, 0.0  ;;  %v663_v18 = vmul.f32 %v2526_v35, %v636_v5  ;;  %v622_v15 = vmax.f32 %v598_v42, 0.0  ;;  %v643_v25 = vmul.f32 %v637_v13, %v616_v16 }
 0x15a   :  { %v662_v12 = vmul.f32 %v2515_v24, %v635_v2  ;;  %v625_v24 = vmax.f32 %v2507_v14, 0.0  ;;  %v665_v28 = vsel %vm664_vm3, %v640_v22, 0.0  ;;  %v646_v62 = vmul.f32 %v637_v13, %v619_v19 }
 0x15b   :  { %678 = vadd.xlane.f32.xlu1 %v677_v0  ;;  %v734_v23 = vsel %vm664_vm3, %v663_v18, 0.0  ;;  %v628_v35 = vmax.f32 %v2517_v27, 0.0  ;;  %v674_v26 = vsel %vm664_vm3, %v643_v25, 0.0  ;;  %v649_v20 = vmul.f32 %v637_v13, %v622_v15 }
 0x15c   :  { %v731_v21 = vsel %vm664_vm3, %v662_v12, 0.0  ;;  %v631_v29 = vmax.f32 %v2550_v11, 0.0  ;;  %v683_v30 = vsel %vm664_vm3, %v646_v62, 0.0  ;;  %v652_v31 = vmul.f32 %v637_v13, %v625_v24 }
 0x15d   :  { %687 = vadd.xlane.f32.xlu0 %v686_v3  ;;  %v634_v32 = vmax.f32 %v2564_v34, 0.0  ;;  %v692_v14 = vsel %vm664_vm3, %v649_v20, 0.0  ;;  %v655_v33 = vmul.f32 %v637_v13, %v628_v35  ;;  %v746_v46 = vand.u32 127, %v504_v39 }
 0x15e   :  { %v701_v36 = vsel %vm664_vm3, %v652_v31, 0.0  ;;  %v658_v37 = vmul.f32 %v637_v13, %v631_v29 }
 0x15f   :  { %690 = vadd.xlane.f32.xlu1 %v689_v6  ;;  %v710_v27 = vsel %vm664_vm3, %v655_v33, 0.0  ;;  %v661_v38 = vmul.f32 %v637_v13, %v634_v32  ;;  %v1015_v49 = vadd.s32 4294967288, %v746_v46  ;;  %v2628_v52 = vsub.s32 %v746_v46, %v2471_v41 }
 0x160   :  { %v719_v11 = vsel %vm664_vm3, %v658_v37, 0.0 }
 0x161   :  { %723 = vadd.xlane.f32.xlu0 %v722_v10  ;;  %v728_v40 = vsel %vm664_vm3, %v661_v38, 0.0  ;;  %v2631_v55 = vsub.s32 %v1015_v49, %v2471_v41 }
 0x163   :  { %726 = vadd.xlane.f32.xlu1 %v725_v17 }
 0x165   :  { %732 = vadd.xlane.f32.xlu0 %v731_v21 }
 0x167   :  { %735 = vadd.xlane.f32.xlu1 %v734_v23 }
 0x169   :  { %666 = vadd.xlane.f32.xlu0 %v665_v28 }
 0x16b   :  { %675 = vadd.xlane.f32.xlu1 %v674_v26 }
 0x16d   :  { %684 = vadd.xlane.f32.xlu0 %v683_v30 }
 0x16f   :  { %693 = vadd.xlane.f32.xlu1 %v692_v14 }
 0x171   :  { %702 = vadd.xlane.f32.xlu0 %v701_v36 }
 0x173   :  { %711 = vadd.xlane.f32.xlu1 %v710_v27 }
 0x175   :  { %720 = vadd.xlane.f32.xlu0 %v719_v11 }
 0x177   :  { %729 = vadd.xlane.f32.xlu1 %v728_v40 }
 0x1d6   :  { %v2608_v42 = vpop.xlane.xlu0 %669 }
 0x1d7   :  { %v2610_v34 = vpop.xlane.xlu1 %699  ;;  %v1014_v54 = vrot.slane %v2608_v42, %v2628_v52 }
 0x1d8   :  { %v1047_v2 = vrot.slane %v2610_v34, %v2631_v55 }
 0x1da   :  { %v2612_v43 = vpop.xlane.xlu0 %705 }
 0x1db   :  { %v1052_v5 = vrot.slane %v2612_v43, %v2628_v52 }
 0x1dc   :  { %v2614_v44 = vpop.xlane.xlu1 %708 }
 0x1dd   :  { %v1056_v63 = vrot.slane %v2614_v44, %v2631_v55 }
 0x1de   :  { %v2616_v45 = vpop.xlane.xlu0 %696 }
 0x1df   :  { %v1043_v57 = vrot.slane %v2616_v45, %v2628_v52  ;;  %v1057_v16 = vsel %vm1020_vm4, %v1056_v63, %v1052_v5 }
 0x1e0   :  { %v2619_v47 = vpop.xlane.xlu1 %717 }
 0x1e1   :  { %v1048_v10 = vsel %vm1020_vm4, %v1047_v2, %v1043_v57  ;;  %v1065_v17 = vrot.slane %v2619_v47, %v2631_v55 }
 0x1e2   :  { %v2621_v48 = vpop.xlane.xlu0 %672 }
 0x1e3   :  { %v1019_v56 = vrot.slane %v2621_v48, %v2631_v55 }
 0x1e4   :  { %v2623_v50 = vpop.xlane.xlu1 %681 }
 0x1e5   :  { %v1029_v58 = vrot.slane %v2623_v50, %v2631_v55  ;;  %v1021_v3 = vsel %vm1020_vm4, %v1019_v56, %v1014_v54 }
 0x1e6   :  { %v2625_v51 = vpop.xlane.xlu0 %714 }
 0x1e7   :  { %v1061_v6 = vrot.slane %v2625_v51, %v2628_v52 }
 0x1e8   :  { %v2633_v8 = vpop.xlane.xlu1 %678 }
 0x1e9   :  { %v1025_v39 = vrot.slane %v2633_v8, %v2628_v52  ;;  %v1066_v23 = vsel %vm1020_vm4, %v1065_v17, %v1061_v6  ;;  %v2319_v6 = vmov 0  }
 0x1ea   :  { %v2641_v59 = vpop.xlane.xlu0 %687  ;;  %2017 = vset.pattern.permute.xlu1 %v2319_v6  ;;  %2016 = vset.pattern.permute.xlu0 %v2319_v6 }
 0x1eb   :  { %v1030_v60 = vsel %vm1020_vm4, %v1029_v58, %v1025_v39  ;;  %v1034_v0 = vrot.slane %v2641_v59, %v2628_v52 }
 0x1ec   :  { %v2648_v61 = vpop.xlane.xlu1 %690  ;;  %v1085_v7 = vsel %vm779_vm5, %v1030_v60, %v1021_v3 }
 0x1ed   :  { %v1038_v1 = vrot.slane %v2648_v61, %v2631_v55 }
 0x1ee   :  { %v2659_v4 = vpop.xlane.xlu0 %723 }
 0x1ef   :  { %v1039_v9 = vsel %vm1020_vm4, %v1038_v1, %v1034_v0  ;;  %v1070_v21 = vrot.slane %v2659_v4, %v2628_v52 }
 0x1f0   :  { %v1086_v12 = vsel %vm781_vm6, %v1039_v9, %v1085_v7  ;;  %v2669_v13 = vpop.xlane.xlu1 %726  ;;  %v2736_v7 = vsub.s32 1, %v2471_v41 }
 0x1f1   :  { %v1074_v18 = vrot.slane %v2669_v13, %v2631_v55  ;;  %v1087_v19 = vsel %vm783_vm7, %v1048_v10, %v1086_v12  ;;  %v2740_v12 = vsub.s32 4, %v2471_v41 }
 0x1f2   :  { %v2679_v22 = vpop.xlane.xlu0 %732  ;;  %v1088_v15 = vsel %vm785_vm8, %v1057_v16, %v1087_v19  ;;  %v2746_v19 = vsub.s32 2, %v2471_v41 }
 0x1f3   :  { %v1075_v24 = vsel %vm1020_vm4, %v1074_v18, %v1070_v21  ;;  %v1089_v28 = vsel %vm787_vm9, %v1066_v23, %v1088_v15  ;;  %v1079_v62 = vrot.slane %v2679_v22, %v2628_v52  ;;  %v2749_v21 = vsub.s32 5, %v2471_v41 }
 0x1f4   :  { %v2683_v25 = vpop.xlane.xlu1 %735  ;;  %v1090_v29 = vsel %vm789_vm10, %v1075_v24, %v1089_v28 }
 0x1f5   :  { %v1083_v35 = vrot.slane %v2683_v25, %v2631_v55 }
 0x1f6   :  { %v2691_v26 = vpop.xlane.xlu0 %666 }
 0x1f7   :  { %v1084_v20 = vsel %vm1020_vm4, %v1083_v35, %v1079_v62  ;;  %v750_v32 = vrot.slane %v2691_v26, %v2628_v52  ;;  %v2756_v62 = vsub.s32 6, %v2471_v41 }
 0x1f8   :  { %v2695_v30 = vpop.xlane.xlu1 %675  ;;  %v1091_v31 = vsel %vm791_vm11, %v1084_v20, %v1090_v29 }
 0x1f9   :  { %v754_v14 = vrot.slane %v2695_v30, %v2628_v52  ;;  %v1094_v33 = vsel %vm1093_vm12, %v1091_v31, -inf  ;;  %v2769_v31 = vsub.s32 7, %v2471_v41 }
 0x1fa   :  { %v2703_v36 = vpop.xlane.xlu0 %684  ;;  %1095 = vmax.xlane.f32.xlu0 %v1094_v33 }
 0x1fb   :  { %v780_v37 = vsel %vm779_vm5, %v754_v14, %v750_v32  ;;  %v758_v27 = vrot.slane %v2703_v36, %v2628_v52 }
 0x1fc   :  { %v2708_v38 = vpop.xlane.xlu1 %693 }
 0x1fd   :  { %v782_v11 = vsel %vm781_vm6, %v758_v27, %v780_v37  ;;  %v762_v40 = vrot.slane %v2708_v38, %v2628_v52 }
 0x1fe   :  { %v2713_v46 = vpop.xlane.xlu0 %702 }
 0x1ff   :  { %v784_v49 = vsel %vm783_vm7, %v762_v40, %v782_v11  ;;  %v766_v39 = vrot.slane %v2713_v46, %v2628_v52 }
 0x200   :  { %v2718_v56 = vpop.xlane.xlu1 %711 }
 0x201   :  { %v786_v58 = vsel %vm785_vm8, %v766_v39, %v784_v49  ;;  %v770_v54 = vrot.slane %v2718_v56, %v2628_v52 }
 0x202   :  { %v2723_v57 = vpop.xlane.xlu0 %720 }
 0x203   :  { %v774_v60 = vrot.slane %v2723_v57, %v2628_v52  ;;  %v788_v63 = vsel %vm787_vm9, %v770_v54, %v786_v58 }
 0x204   :  { %v2728_v0 = vpop.xlane.xlu1 %729 }
 0x205   :  { %v778_v1 = vrot.slane %v2728_v0, %v2628_v52  ;;  %v790_v2 = vsel %vm789_vm10, %v774_v60, %v788_v63 }
 0x207   :  { %v792_v3 = vsel %vm791_vm11, %v778_v1, %v790_v2 }
 0x208   :  { %v795_v5 = vsel %vm794_vm13, %v792_v3, -inf }
 0x209   :  { %796 = vmax.xlane.f32.xlu1 %v795_v5 }
 0x287   :  { %v1096_v9 = vpop.xlane.xlu0 %1095 }
 0x288   :  { %v1101_v10 = vrot.slane %v1096_v9, %v2480_v53  ;;  %v1105_v16 = vrot.slane %v1096_v9, %v2736_v7  ;;  %v2752_v15 = vrot.slane %v1096_v9, %v2740_v12  ;;  %v2761_v35 = vrot.slane %v1096_v9, %v2749_v21 }
 0x28a   :  { %v1138_v17 = vsub.f32 %v2608_v42, %v1101_v10  ;;  %v1139_v18 = vsub.f32 %v2621_v48, %v1101_v10  ;;  %v1140_v23 = vsub.f32 %v2633_v8, %v1105_v16  ;;  %v1109_v42 = vrot.slane %v1096_v9, %v2746_v19 }
 0x28b   :  { %v1141_v48 = vsub.f32 %v2623_v50, %v1105_v16  ;;  %v1147_v20 = vsub.f32 %v2614_v44, %v2752_v15  ;;  %v2766_v8 = vsub.s32 3, %v2471_v41  ;;  %v2773_v50 = vrot.slane %v1096_v9, %v2756_v62 }
 0x28c   :  { %v1154_v24 = vmul.f32 1.442695, %v1138_v17  ;;  %v1156_v28 = vmul.f32 1.442695, %v1139_v18  ;;  %v1158_v29 = vmul.f32 1.442695, %v1140_v23  ;;  %v1142_v32 = vsub.f32 %v2641_v59, %v1109_v42 }
 0x28d   :  { %v1160_v14 = vmul.f32 1.442695, %v1141_v48  ;;  %v1149_v33 = vsub.f32 %v2619_v47, %v2761_v35  ;;  %v1172_v37 = vmul.f32 1.442695, %v1147_v20  ;;  %v1113_v44 = vrot.slane %v1096_v9, %v2766_v8 }
 0x28e   :  { %2018 = vpow2.f32 %v1154_v24  ;;  %v1143_v27 = vsub.f32 %v2648_v61, %v1109_v42  ;;  %v1162_v11 = vmul.f32 1.442695, %v1142_v32  ;;  %v2780_v41 = vrot.slane %v1096_v9, %v2769_v31 }
 0x28f   :  { %2020 = vpow2.f32 %v1156_v28  ;;  %v1151_v59 = vsub.f32 %v2669_v13, %v2773_v50  ;;  %v1176_v40 = vmul.f32 1.442695, %v1149_v33  ;;  %v1144_v61 = vsub.f32 %v2616_v45, %v1113_v44 }
 0x290   :  { %2022 = vpow2.f32 %v1158_v29  ;;  %v1164_v58 = vmul.f32 1.442695, %v1143_v27  ;;  %v1153_v54 = vsub.f32 %v2683_v25, %v2780_v41  ;;  %v1145_v1 = vsub.f32 %v2610_v34, %v1113_v44 }
 0x291   :  { %2024 = vpow2.f32 %v1160_v14  ;;  %v1180_v13 = vmul.f32 1.442695, %v1151_v59  ;;  %v1166_v2 = vmul.f32 1.442695, %v1144_v61  ;;  %v1146_v9 = vsub.f32 %v2612_v43, %v2752_v15 }
 0x292   :  { %2026 = vpow2.f32 %v1172_v37  ;;  %v1184_v45 = vmul.f32 1.442695, %v1153_v54  ;;  %v1168_v34 = vmul.f32 1.442695, %v1145_v1  ;;  %v1148_v43 = vsub.f32 %v2625_v51, %v2761_v35 }
 0x293   :  { %2028 = vpow2.f32 %v1162_v11  ;;  %v1170_v15 = vmul.f32 1.442695, %v1146_v9  ;;  %v1150_v51 = vsub.f32 %v2659_v4, %v2773_v50  ;;  %v1152_v4 = vsub.f32 %v2679_v22, %v2780_v41 }
 0x294   :  { %2030 = vpow2.f32 %v1176_v40  ;;  %v1174_v48 = vmul.f32 1.442695, %v1148_v43 }
 0x295   :  { %2032 = vpow2.f32 %v1164_v58  ;;  %v1178_v32 = vmul.f32 1.442695, %v1150_v51  ;;  %v1182_v37 = vmul.f32 1.442695, %v1152_v4 }
 0x296   :  { %v2786_v39 = vpop.xlane.xlu1 %796  ;;  %2034 = vpow2.f32 %v1180_v13 }
 0x297   :  { %v806_v60 = vrot.slane %v2786_v39, %v2736_v7  ;;  %v814_v3 = vrot.slane %v2786_v39, %v2766_v8  ;;  %2036 = vpow2.f32 %v1166_v2  ;;  %v822_v10 = vrot.slane %v2786_v39, %v2749_v21 }
 0x298   :  { %v2784_v49 = vpop.eup %2018  ;;  %2038 = vpow2.f32 %v1184_v45  ;;  %v830_v23 = vrot.slane %v2786_v39, %v2769_v31  ;;  %v802_v14 = vrot.slane %v2786_v39, %v2480_v53  ;;  %v810_v44 = vrot.slane %v2786_v39, %v2746_v19 }
 0x299   :  { %v2788_v47 = vpop.eup %2020  ;;  %1203 = vperm.xlu0 %2016, %v2784_v49   ;;  %v840_v25 = vsub.f32 %v2695_v30, %v806_v60  ;;  %v842_v16 = vsub.f32 %v2708_v38, %v814_v3  ;;  %2040 = vpow2.f32 %v1168_v34  ;;  %v844_v24 = vsub.f32 %v2718_v56, %v822_v10 }
 0x29a   :  { %1206 = vperm.xlu1 %2017, %v2788_v47   ;;  %v2797_v63 = vpop.eup %2022  ;;  %v846_v35 = vsub.f32 %v2728_v0, %v830_v23  ;;  %v839_v22 = vsub.f32 %v2691_v26, %v802_v14  ;;  %v818_v41 = vrot.slane %v2786_v39, %v2740_v12  ;;  %v841_v59 = vsub.f32 %v2703_v36, %v810_v44 }
 0x29b   :  { %v2804_v5 = vpop.eup %2024  ;;  %v849_v30 = vmul.f32 1.442695, %v840_v25  ;;  %v853_v38 = vmul.f32 1.442695, %v842_v16  ;;  %v857_v20 = vmul.f32 1.442695, %v844_v24  ;;  %v826_v26 = vrot.slane %v2786_v39, %v2756_v62 }
 0x29c   :  { %v2806_v6 = vpop.eup %2026  ;;  %v861_v0 = vmul.f32 1.442695, %v846_v35  ;;  %v847_v40 = vmul.f32 1.442695, %v839_v22  ;;  %v843_v54 = vsub.f32 %v2713_v46, %v818_v41  ;;  %v851_v13 = vmul.f32 1.442695, %v841_v59 }
 0x29d   :  { %1230 = vperm.xlu0 %2016, %v2806_v6   ;;  %v2815_v17 = vpop.eup %2028  ;;  %2042 = vpow2.f32 %v849_v30  ;;  %v845_v36 = vsub.f32 %v2723_v57, %v826_v26 }
 0x29e   :  { %1209 = vperm.xlu1 %2017, %v2797_v63   ;;  %v2817_v18 = vpop.eup %2030  ;;  %2044 = vpow2.f32 %v1170_v15  ;;  %v855_v2 = vmul.f32 1.442695, %v843_v54 }
 0x29f   :  { %v2826_v28 = vpop.eup %2032  ;;  %2046 = vpow2.f32 %v853_v38  ;;  %v859_v46 = vmul.f32 1.442695, %v845_v36 }
 0x2a0   :  { %v2828_v42 = vpop.eup %2034  ;;  %2048 = vpow2.f32 %v1174_v48 }
 0x2a1   :  { %1236 = vperm.xlu0 %2016, %v2817_v18   ;;  %v2835_v56 = vpop.eup %2036  ;;  %2050 = vpow2.f32 %v857_v20 }
 0x2a2   :  { %1212 = vperm.xlu1 %2017, %v2804_v5   ;;  %v2837_v29 = vpop.eup %2038  ;;  %2052 = vpow2.f32 %v1178_v32 }
 0x2a3   :  { %v2845_v50 = vpop.eup %2040  ;;  %2054 = vpow2.f32 %v861_v0 }
 0x2a4   :  { %2056 = vpow2.f32 %v1182_v37 }
 0x2a5   :  { %1242 = vperm.xlu0 %2016, %v2828_v42   ;;  %2058 = vpow2.f32 %v847_v40 }
 0x2a6   :  { %1215 = vperm.xlu1 %2017, %v2815_v17   ;;  %2060 = vpow2.f32 %v851_v13 }
 0x2a7   :  { %v2847_v33 = vpop.eup %2042  ;;  %2062 = vpow2.f32 %v855_v2 }
 0x2a8   :  { %v2854_v27 = vpop.eup %2044  ;;  %2064 = vpow2.f32 %v859_v46 }
 0x2a9   :  { %1248 = vperm.xlu0 %2016, %v2837_v29   ;;  %v2856_v11 = vpop.eup %2046 }
 0x2aa   :  { %1218 = vperm.xlu1 %2017, %v2826_v28   ;;  %v2863_v61 = vpop.eup %2048 }
 0x2ab   :  { %v2865_v58 = vpop.eup %2050 }
 0x2ac   :  { %v2872_v60 = vpop.eup %2052 }
 0x2ad   :  { %875 = vperm.xlu0 %2016, %v2847_v33   ;;  %v2874_v1 = vpop.eup %2054 }
 0x2ae   :  { %1221 = vperm.xlu1 %2017, %v2835_v56   ;;  %v2879_v45 = vpop.eup %2056 }
 0x2af   :  { %v2882_v39 = vpop.eup %2058 }
 0x2b0   :  { %v2885_v3 = vpop.eup %2060 }
 0x2b1   :  { %881 = vperm.xlu0 %2016, %v2856_v11   ;;  %v2888_v25 = vpop.eup %2062 }
 0x2b2   :  { %1224 = vperm.xlu1 %2017, %v2845_v50   ;;  %v2891_v57 = vpop.eup %2064 }
 0x2b5   :  { %887 = vperm.xlu0 %2016, %v2865_v58  }
 0x2b6   :  { %1227 = vperm.xlu1 %2017, %v2854_v27  }
 0x2b9   :  { %893 = vperm.xlu0 %2016, %v2874_v1  }
 0x2ba   :  { %1233 = vperm.xlu1 %2017, %v2863_v61  }
 0x2be   :  { %1239 = vperm.xlu1 %2017, %v2872_v60  }
 0x2c2   :  { %1245 = vperm.xlu1 %2017, %v2879_v45  }
 0x2c6   :  { %872 = vperm.xlu1 %2017, %v2882_v39  }
 0x2ca   :  { %878 = vperm.xlu1 %2017, %v2885_v3  }
 0x2ce   :  { %884 = vperm.xlu1 %2017, %v2888_v25  }
 0x2d2   :  { %890 = vperm.xlu1 %2017, %v2891_v57  }
 0x318   :  { %v1204_v10 = vpop.permute.xlu0 %1203 }
 0x319   :  { %v1207_v9 = vpop.permute.xlu1 %1206  ;;  %v1253_v14 = vrot.slane %v1204_v10, %v2628_v52 }
 0x31a   :  { %v1257_v0 = vrot.slane %v1207_v9, %v2631_v55 }
 0x31c   :  { %v1231_v43 = vpop.permute.xlu0 %1230  ;;  %v1258_v2 = vsel %vm1020_vm4, %v1257_v0, %v1253_v14 }
 0x31d   :  { %v1210_v34 = vpop.permute.xlu1 %1209  ;;  %v1293_v54 = vrot.slane %v1231_v43, %v2631_v55 }
 0x31e   :  { %v1262_v37 = vrot.slane %v1210_v34, %v2628_v52 }
 0x320   :  { %v1237_v23 = vpop.permute.xlu0 %1236 }
 0x321   :  { %v1213_v16 = vpop.permute.xlu1 %1212  ;;  %v1302_v46 = vrot.slane %v1237_v23, %v2631_v55 }
 0x322   :  { %v1266_v35 = vrot.slane %v1213_v16, %v2631_v55 }
 0x324   :  { %v1243_v51 = vpop.permute.xlu0 %1242  ;;  %v1267_v59 = vsel %vm1020_vm4, %v1266_v35, %v1262_v37 }
 0x325   :  { %v1216_v30 = vpop.permute.xlu1 %1215  ;;  %v1322_v16 = vsel %vm779_vm5, %v1267_v59, %v1258_v2 }
 0x326   :  { %v1271_v22 = vrot.slane %v1216_v30, %v2628_v52  ;;  %v1311_v30 = vrot.slane %v1243_v51, %v2631_v55 }
 0x328   :  { %v1249_v20 = vpop.permute.xlu0 %1248 }
 0x329   :  { %v1219_v15 = vpop.permute.xlu1 %1218  ;;  %v1320_v35 = vrot.slane %v1249_v20, %v2631_v55 }
 0x32a   :  { %v1275_v32 = vrot.slane %v1219_v15, %v2631_v55 }
 0x32c   :  { %v1276_v13 = vsel %vm1020_vm4, %v1275_v32, %v1271_v22  ;;  %v876_v9 = vpop.permute.xlu0 %875 }
 0x32d   :  { %v1222_v24 = vpop.permute.xlu1 %1221  ;;  %v1323_v43 = vsel %vm781_vm6, %v1276_v13, %v1322_v16  ;;  %v902_v20 = vrot.slane %v876_v9, %v2628_v52 }
 0x32e   :  { %v1280_v40 = vrot.slane %v1222_v24, %v2628_v52 }
 0x330   :  { %v882_v51 = vpop.permute.xlu0 %881 }
 0x331   :  { %v1225_v38 = vpop.permute.xlu1 %1224  ;;  %v910_v2 = vrot.slane %v882_v51, %v2628_v52 }
 0x332   :  { %v1284_v44 = vrot.slane %v1225_v38, %v2631_v55 }
 0x334   :  { %v1285_v34 = vsel %vm1020_vm4, %v1284_v44, %v1280_v40 }
 0x335   :  { %v1228_v48 = vpop.permute.xlu1 %1227  ;;  %v1324_v38 = vsel %vm783_vm7, %v1285_v34, %v1323_v43 }
 0x336   :  { %v1289_v41 = vrot.slane %v1228_v48, %v2628_v52 }
 0x338   :  { %v1294_v15 = vsel %vm1020_vm4, %v1293_v54, %v1289_v41 }
 0x339   :  { %v1234_v4 = vpop.permute.xlu1 %1233  ;;  %v1325_v32 = vsel %vm785_vm8, %v1294_v15, %v1324_v38 }
 0x33a   :  { %v1298_v26 = vrot.slane %v1234_v4, %v2628_v52 }
 0x33c   :  { %v1303_v24 = vsel %vm1020_vm4, %v1302_v46, %v1298_v26  ;;  %v888_v26 = vpop.permute.xlu0 %887 }
 0x33d   :  { %v1240_v36 = vpop.permute.xlu1 %1239  ;;  %v1326_v14 = vsel %vm787_vm9, %v1303_v24, %v1325_v32  ;;  %v918_v9 = vrot.slane %v888_v26, %v2628_v52 }
 0x33e   :  { %v1307_v10 = vrot.slane %v1240_v36, %v2628_v52 }
 0x340   :  { %v1312_v48 = vsel %vm1020_vm4, %v1311_v30, %v1307_v10  ;;  %v894_v16 = vpop.permute.xlu0 %893 }
 0x341   :  { %v1246_v23 = vpop.permute.xlu1 %1245  ;;  %v1327_v37 = vsel %vm789_vm10, %v1312_v48, %v1326_v14  ;;  %v926_v24 = vrot.slane %v894_v16, %v2628_v52 }
 0x342   :  { %v1316_v4 = vrot.slane %v1246_v23, %v2628_v52 }
 0x344   :  { %v1321_v0 = vsel %vm1020_vm4, %v1320_v35, %v1316_v4 }
 0x345   :  { %v873_v44 = vpop.permute.xlu1 %872  ;;  %v1328_v22 = vsel %vm791_vm11, %v1321_v0, %v1327_v37 }
 0x346   :  { %v1330_v41 = vsel %vm1093_vm12, %v1328_v22, 0.0  ;;  %v898_v59 = vrot.slane %v873_v44, %v2628_v52 }
 0x347   :  { %1331 = vadd.xlane.f32.xlu1 %v1330_v41 }
 0x348   :  { %v927_v13 = vsel %vm779_vm5, %v902_v20, %v898_v59 }
 0x349   :  { %v879_v40 = vpop.permute.xlu1 %878 }
 0x34a   :  { %v906_v54 = vrot.slane %v879_v40, %v2628_v52 }
 0x34c   :  { %v928_v36 = vsel %vm781_vm6, %v906_v54, %v927_v13 }
 0x34d   :  { %v885_v46 = vpop.permute.xlu1 %884  ;;  %v929_v10 = vsel %vm783_vm7, %v910_v2, %v928_v36 }
 0x34e   :  { %v914_v34 = vrot.slane %v885_v46, %v2628_v52 }
 0x350   :  { %v930_v30 = vsel %vm785_vm8, %v914_v34, %v929_v10 }
 0x351   :  { %v891_v15 = vpop.permute.xlu1 %890  ;;  %v931_v38 = vsel %vm787_vm9, %v918_v9, %v930_v30 }
 0x352   :  { %v922_v43 = vrot.slane %v891_v15, %v2628_v52 }
 0x354   :  { %v932_v48 = vsel %vm789_vm10, %v922_v43, %v931_v38 }
 0x355   :  { %v933_v23 = vsel %vm791_vm11, %v926_v24, %v932_v48 }
 0x356   :  { %v935_v35 = vsel %vm794_vm13, %v933_v23, 0.0 }
 0x357   :  { %936 = vadd.xlane.f32.xlu0 %v935_v35 }
 0x3d4   :  { %v1332_v32 = vpop.xlane.xlu1 %1331 }
 0x3d5   :  { %v1337_v4 = vrot.slane %v1332_v32, %v2480_v53  ;;  %v1341_v14 = vrot.slane %v1332_v32, %v2736_v7  ;;  %v1345_v51 = vrot.slane %v1332_v32, %v2746_v19  ;;  %v1349_v0 = vrot.slane %v1332_v32, %v2766_v8 }
 0x3d6   :  { %v1353_v44 = vrot.slane %v1332_v32, %v2740_v12  ;;  %v1357_v20 = vrot.slane %v1332_v32, %v2749_v21  ;;  %v1361_v13 = vrot.slane %v1332_v32, %v2756_v62  ;;  %v1365_v46 = vrot.slane %v1332_v32, %v2769_v31 }
 0x3d7   :  { %2066 = vrcp.f32 %v1337_v4 }
 0x3d8   :  { %2068 = vrcp.f32 %v1341_v14 }
 0x3d9   :  { %2070 = vrcp.f32 %v1345_v51 }
 0x3da   :  { %2072 = vrcp.f32 %v1349_v0  ;;  %v2099_v0 = vld [vmem:[#allocation2 + $0x8] sm:$0xff] }
 0x3db   :  { %2074 = vrcp.f32 %v1353_v44 }
 0x3dc   :  { %2076 = vrcp.f32 %v1357_v20 }
 0x3dd   :  { %2078 = vrcp.f32 %v1361_v13 }
 0x3de   :  { %2080 = vrcp.f32 %v1365_v46 }
 0x3e1   :  { %v2067_v37 = vpop.eup %2066 }
 0x3e2   :  { %v1376_v22 = vmul.f32 %v2067_v37, %v2788_v47  ;;  %v1375_v41 = vmul.f32 %v2067_v37, %v2784_v49  ;;  %v2069_v59 = vpop.eup %2068 }
 0x3e3   :  { %v1378_v40 = vmul.f32 %v2069_v59, %v2797_v63  ;;  %v1379_v26 = vmul.f32 %v2069_v59, %v2804_v5  ;;  %v2071_v54 = vpop.eup %2070  ;;  %v2100_v59 = vld [vmem:[#allocation2 + $0x20] sm:$0xff] }
 0x3e4   :  { %1509 = vperm.xlu1 %2017, %v1376_v22   ;;  %1504 = vperm.xlu0 %2016, %v1375_v41   ;;  %v1381_v47 = vmul.f32 %v2071_v54, %v2815_v17  ;;  %v1382_v49 = vmul.f32 %v2071_v54, %v2826_v28  ;;  %v2073_v36 = vpop.eup %2072  ;;  %v937_v2 = vpop.xlane.xlu0 %936 }
 0x3e5   :  { %v1384_v63 = vmul.f32 %v2073_v36, %v2835_v56  ;;  %v1385_v5 = vmul.f32 %v2073_v36, %v2845_v50  ;;  %v2075_v34 = vpop.eup %2074  ;;  %v942_v10 = vrot.slane %v937_v2, %v2480_v53  ;;  %v946_v17 = vrot.slane %v937_v2, %v2736_v7 }
 0x3e6   :  { %v1387_v28 = vmul.f32 %v2075_v34, %v2854_v27  ;;  %v1388_v16 = vmul.f32 %v2075_v34, %v2806_v6  ;;  %v2077_v30 = vpop.eup %2076  ;;  %v950_v56 = vrot.slane %v937_v2, %v2746_v19  ;;  %v954_v50 = vrot.slane %v937_v2, %v2766_v8  ;;  %v2103_v34 = vld [vmem:[#allocation2 + $0x40] sm:$0xff] }
 0x3e7   :  { %2082 = vrcp.f32 %v942_v10  ;;  %v1390_v9 = vmul.f32 %v2077_v30, %v2863_v61  ;;  %v1391_v53 = vmul.f32 %v2077_v30, %v2817_v18  ;;  %v2079_v15 = vpop.eup %2078  ;;  %v958_v7 = vrot.slane %v937_v2, %v2740_v12 }
 0x3e8   :  { %1514 = vperm.xlu1 %2017, %v1378_v40   ;;  %1519 = vperm.xlu0 %2016, %v1379_v26   ;;  %2084 = vrcp.f32 %v946_v17  ;;  %v962_v6 = vrot.slane %v937_v2, %v2749_v21  ;;  %v1393_v27 = vmul.f32 %v2079_v15, %v2872_v60  ;;  %v1394_v19 = vmul.f32 %v2079_v15, %v2828_v42  ;;  %v2081_v43 = vpop.eup %2080 }
 0x3e9   :  { %2086 = vrcp.f32 %v950_v56  ;;  %v966_v8 = vrot.slane %v937_v2, %v2756_v62  ;;  %v970_v18 = vrot.slane %v937_v2, %v2769_v31  ;;  %v1396_v24 = vmul.f32 %v2081_v43, %v2879_v45 }
 0x3ea   :  { %2088 = vrcp.f32 %v954_v50  ;;  %v1397_v12 = vmul.f32 %v2081_v43, %v2837_v29 }
 0x3eb   :  { %2090 = vrcp.f32 %v958_v7 }
 0x3ec   :  { %1524 = vperm.xlu1 %2017, %v1381_v47   ;;  %1529 = vperm.xlu0 %2016, %v1382_v49   ;;  %2092 = vrcp.f32 %v962_v6 }
 0x3ed   :  { %2094 = vrcp.f32 %v966_v8  ;;  %v2104_v8 = vld [vmem:[#allocation2 + $0x50] sm:$0xff] }
 0x3ee   :  { %2096 = vrcp.f32 %v970_v18 }
 0x3f0   :  { %1534 = vperm.xlu1 %2017, %v1384_v63   ;;  %1539 = vperm.xlu0 %2016, %v1385_v5   ;;  %v2102_v63 = vld [vmem:[#allocation2 + $0x38] sm:$0xff] }
 0x3f1   :  { %v2083_v61 = vpop.eup %2082 }
 0x3f2   :  { %v2085_v38 = vpop.eup %2084  ;;  %v980_v42 = vmul.f32 %v2083_v61, %v2882_v39 }
 0x3f3   :  { %v2087_v21 = vpop.eup %2086  ;;  %v982_v60 = vmul.f32 %v2085_v38, %v2847_v33 }
 0x3f4   :  { %1544 = vperm.xlu1 %2017, %v1387_v28   ;;  %1549 = vperm.xlu0 %2016, %v1388_v16   ;;  %v2089_v48 = vpop.eup %2088  ;;  %v984_v31 = vmul.f32 %v2087_v21, %v2885_v3 }
 0x3f5   :  { %v2091_v62 = vpop.eup %2090  ;;  %v986_v45 = vmul.f32 %v2089_v48, %v2856_v11  ;;  %v2098_v11 = vld [vmem:[#allocation2 + $0x10] sm:$0xff] }
 0x3f6   :  { %v2093_v23 = vpop.eup %2092  ;;  %v988_v35 = vmul.f32 %v2091_v62, %v2888_v25 }
 0x3f7   :  { %v2095_v29 = vpop.eup %2094  ;;  %v990_v32 = vmul.f32 %v2093_v23, %v2865_v58 }
 0x3f8   :  { %1554 = vperm.xlu1 %2017, %v1390_v9   ;;  %1559 = vperm.xlu0 %2016, %v1391_v53   ;;  %v2097_v4 = vpop.eup %2096  ;;  %v992_v33 = vmul.f32 %v2095_v29, %v2891_v57  ;;  %v2101_v57 = vld [vmem:[#allocation2 + $0x28] sm:$0xff] }
 0x3f9   :  { %v994_v39 = vmul.f32 %v2097_v4, %v2874_v1 }
 0x3fc   :  { %1564 = vperm.xlu1 %2017, %v1393_v27   ;;  %1569 = vperm.xlu0 %2016, %v1394_v19  }
 0x400   :  { %1574 = vperm.xlu1 %2017, %v1396_v24   ;;  %1579 = vperm.xlu0 %2016, %v1397_v12   ;;  %v2105_v24 = vld [vmem:[#allocation2 + $0x58] sm:$0xff] }
 0x404   :  { %1400 = vperm.xlu1 %2017, %v980_v42   ;;  %1405 = vperm.xlu0 %2016, %v982_v60  }
 0x408   :  { %1410 = vperm.xlu1 %2017, %v984_v31   ;;  %1415 = vperm.xlu0 %2016, %v986_v45  }
 0x40c   :  { %1420 = vperm.xlu1 %2017, %v988_v35   ;;  %1425 = vperm.xlu0 %2016, %v990_v32  }
 0x410   :  { %1430 = vperm.xlu1 %2017, %v992_v33   ;;  %1435 = vperm.xlu0 %2016, %v994_v39  }
 0x463   :  { %v1510_v3 = vpop.permute.xlu1 %1509  ;;  %v1505_v14 = vpop.permute.xlu0 %1504 }
 0x464   :  { %v1583_v51 = vmul.f32 %v2098_v11, %v1510_v3  ;;  %v1582_v37 = vmul.f32 %v2099_v0, %v1505_v14  ;;  %v1755_v17 = vrot.slane %v1510_v3, %v2631_v55  ;;  %v1751_v16 = vrot.slane %v1505_v14, %v2628_v52  ;;  %v2106_v3 = vld [vmem:[#allocation2 + $0x68] sm:$0xff] }
 0x466   :  { %v1599_v44 = vsel %vm210_vm1, %v1583_v51, 0.0  ;;  %v1598_v25 = vsel %vm210_vm1, %v1582_v37, 0.0  ;;  %v1756_v21 = vsel %vm1020_vm4, %v1755_v17, %v1751_v16  ;;  %v2107_v51 = vld [vmem:[#allocation2 + $0x70] sm:$0xff] }
 0x467   :  { %v1600_v58 = vadd.f32 %v1599_v44, %v1598_v25  ;;  %v1515_v22 = vpop.permute.xlu1 %1514  ;;  %v1520_v41 = vpop.permute.xlu0 %1519 }
 0x468   :  { %v1584_v20 = vmul.f32 %v2100_v59, %v1515_v22  ;;  %v1585_v40 = vmul.f32 %v2101_v57, %v1520_v41  ;;  %v1760_v54 = vrot.slane %v1515_v22, %v2628_v52  ;;  %v1764_v47 = vrot.slane %v1520_v41, %v2631_v55 }
 0x469   :  { %v1601_v1 = vrot.slane %v1600_v58, 4 }
 0x46a   :  { %v1607_v26 = vsel %vm210_vm1, %v1584_v20, 0.0  ;;  %v1608_v13 = vsel %vm210_vm1, %v1585_v40, 0.0  ;;  %v1765_v56 = vsel %vm1020_vm4, %v1764_v47, %v1760_v54 }
 0x46b   :  { %v1602_v49 = vadd.f32 %v1601_v1, %v1600_v58  ;;  %v1609_v36 = vadd.f32 %v1608_v13, %v1607_v26  ;;  %v1525_v2 = vpop.permute.xlu1 %1524  ;;  %v1530_v46 = vpop.permute.xlu0 %1529  ;;  %v1820_v62 = vsel %vm779_vm5, %v1765_v56, %v1756_v21 }
 0x46c   :  { %v1586_v5 = vmul.f32 %v2102_v63, %v1525_v2  ;;  %v1587_v10 = vmul.f32 %v2103_v34, %v1530_v46  ;;  %v1769_v9 = vrot.slane %v1525_v2, %v2628_v52  ;;  %v1773_v27 = vrot.slane %v1530_v46, %v2631_v55  ;;  %v2109_v46 = vld [vmem:[#allocation2 + $0x88] sm:$0xff] }
 0x46d   :  { %v1603_v28 = vrot.slane %v1602_v49, 2  ;;  %v1610_v30 = vrot.slane %v1609_v36, 4 }
 0x46e   :  { %v1616_v50 = vsel %vm210_vm1, %v1586_v5, 0.0  ;;  %v1617_v53 = vsel %vm210_vm1, %v1587_v10, 0.0  ;;  %v1774_v35 = vsel %vm1020_vm4, %v1773_v27, %v1769_v9  ;;  %v2110_v27 = vld [vmem:[#allocation2 + $0x98] sm:$0xff] }
 0x46f   :  { %v1604_v15 = vadd.f32 %v1603_v28, %v1602_v49  ;;  %v1611_v7 = vadd.f32 %v1610_v30, %v1609_v36  ;;  %v1618_v6 = vadd.f32 %v1617_v53, %v1616_v50  ;;  %v1535_v19 = vpop.permute.xlu1 %1534  ;;  %v1540_v43 = vpop.permute.xlu0 %1539  ;;  %v1821_v41 = vsel %vm781_vm6, %v1774_v35, %v1820_v62  ;;  %v2108_v36 = vld [vmem:[#allocation2 + $0x80] sm:$0xff] }
 0x470   :  { %v1588_v18 = vmul.f32 %v2104_v8, %v1535_v19  ;;  %v1778_v61 = vrot.slane %v1535_v19, %v2628_v52  ;;  %v1589_v12 = vmul.f32 %v2105_v24, %v1540_v43  ;;  %v1782_v38 = vrot.slane %v1540_v43, %v2631_v55  ;;  %v2111_v8 = vld [vmem:[#allocation2 + $0xa0] sm:$0xff] }
 0x471   :  { %v1612_v42 = vrot.slane %v1611_v7, 2  ;;  %v1619_v60 = vrot.slane %v1618_v6, 4  ;;  %v1605_v48 = vrot.slane %v1604_v15, 1 }
 0x472   :  { %v1625_v31 = vsel %vm210_vm1, %v1588_v18, 0.0  ;;  %v1626_v45 = vsel %vm210_vm1, %v1589_v12, 0.0  ;;  %v1783_v39 = vsel %vm1020_vm4, %v1782_v38, %v1778_v61 }
 0x473   :  { %v1613_v23 = vadd.f32 %v1612_v42, %v1611_v7  ;;  %v1620_v29 = vadd.f32 %v1619_v60, %v1618_v6  ;;  %v1627_v32 = vadd.f32 %v1626_v45, %v1625_v31  ;;  %v1545_v4 = vpop.permute.xlu1 %1544  ;;  %v1550_v33 = vpop.permute.xlu0 %1549  ;;  %v1606_v22 = vadd.f32 %v1605_v48, %v1604_v15 }
 0x474   :  { %v1590_v14 = vmul.f32 %v2106_v3, %v1545_v4  ;;  %v1787_v11 = vrot.slane %v1545_v4, %v2628_v52  ;;  %v1591_v0 = vmul.f32 %v2107_v51, %v1550_v33  ;;  %v1791_v58 = vrot.slane %v1550_v33, %v2631_v55  ;;  %v2112_v33 = vld [vmem:[#allocation2 + $0xb0] sm:$0xff] }
 0x475   :  { %v1614_v37 = vrot.slane %v1613_v23, 1  ;;  %v1621_v44 = vrot.slane %v1620_v29, 2  ;;  %v1628_v25 = vrot.slane %v1627_v32, 4  ;;  %v1822_v1 = vsel %vm783_vm7, %v1783_v39, %v1821_v41 }
 0x476   :  { %v1634_v59 = vsel %vm210_vm1, %v1590_v14, 0.0  ;;  %v1635_v20 = vsel %vm210_vm1, %v1591_v0, 0.0  ;;  %v1792_v49 = vsel %vm1020_vm4, %v1791_v58, %v1787_v11  ;;  %v2113_v14 = vld [vmem:[#allocation2 + $0xb8] sm:$0xff] }
 0x477   :  { %v1622_v57 = vadd.f32 %v1621_v44, %v1620_v29  ;;  %v1629_v40 = vadd.f32 %v1628_v25, %v1627_v32  ;;  %v1636_v26 = vadd.f32 %v1635_v20, %v1634_v59  ;;  %v1555_v54 = vpop.permute.xlu1 %1554  ;;  %v1560_v13 = vpop.permute.xlu0 %1559  ;;  %v1615_v47 = vadd.f32 %v1614_v37, %v1613_v23 }
 0x478   :  { %v1592_v2 = vmul.f32 %v2108_v36, %v1555_v54  ;;  %v1593_v63 = vmul.f32 %v2109_v46, %v1560_v13  ;;  %v1796_v17 = vrot.slane %v1555_v54, %v2628_v52  ;;  %v1823_v28 = vsel %vm785_vm8, %v1792_v49, %v1822_v1  ;;  %v2115_v49 = vld [vmem:[#allocation2 + $0x18] sm:$0xff] }
 0x479   :  { %v1623_v5 = vrot.slane %v1622_v57, 1  ;;  %v1630_v34 = vrot.slane %v1629_v40, 2  ;;  %v1637_v10 = vrot.slane %v1636_v26, 4  ;;  %v1800_v56 = vrot.slane %v1560_v13, %v2631_v55  ;;  %v2114_v13 = vld [vmem:[#allocation2] sm:$0xff] }
 0x47a   :  { %v1643_v16 = vsel %vm210_vm1, %v1592_v2, 0.0  ;;  %v1644_v30 = vsel %vm210_vm1, %v1593_v63, 0.0  ;;  %v1695_v61 = vsel %vm779_vm5, %v1615_v47, %v1606_v22 }
 0x47b   :  { %v1624_v50 = vadd.f32 %v1623_v5, %v1622_v57  ;;  %v1631_v9 = vadd.f32 %v1630_v34, %v1629_v40  ;;  %v1638_v53 = vadd.f32 %v1637_v10, %v1636_v26  ;;  %v1645_v15 = vadd.f32 %v1644_v30, %v1643_v16  ;;  %v1565_v7 = vpop.permute.xlu1 %1564  ;;  %v1570_v6 = vpop.permute.xlu0 %1569 }
 0x47c   :  { %v1594_v19 = vmul.f32 %v2110_v27, %v1565_v7  ;;  %v1805_v43 = vrot.slane %v1565_v7, %v2628_v52  ;;  %v1595_v18 = vmul.f32 %v2111_v8, %v1570_v6  ;;  %v1801_v21 = vsel %vm1020_vm4, %v1800_v56, %v1796_v17  ;;  %v2116_v7 = vld [vmem:[#allocation2 + $0x30] sm:$0xff] }
 0x47d   :  { %v1632_v24 = vrot.slane %v1631_v9, 1  ;;  %v1639_v12 = vrot.slane %v1638_v53, 2  ;;  %v1646_v38 = vrot.slane %v1645_v15, 4  ;;  %v1809_v48 = vrot.slane %v1570_v6, %v2631_v55 }
 0x47e   :  { %v1652_v42 = vsel %vm210_vm1, %v1594_v19, 0.0  ;;  %v1653_v60 = vsel %vm210_vm1, %v1595_v18, 0.0  ;;  %v1696_v62 = vsel %vm781_vm6, %v1624_v50, %v1695_v61  ;;  %v1824_v25 = vsel %vm787_vm9, %v1801_v21, %v1823_v28  ;;  %v2117_v19 = vld [vmem:[#allocation2 + $0x48] sm:$0xff] }
 0x47f   :  { %v1633_v31 = vadd.f32 %v1632_v24, %v1631_v9  ;;  %v1640_v45 = vadd.f32 %v1639_v12, %v1638_v53  ;;  %v1647_v23 = vadd.f32 %v1646_v38, %v1645_v15  ;;  %v1654_v29 = vadd.f32 %v1653_v60, %v1652_v42  ;;  %v1575_v35 = vpop.permute.xlu1 %1574  ;;  %v1580_v32 = vpop.permute.xlu0 %1579 }
 0x480   :  { %v1810_v4 = vsel %vm1020_vm4, %v1809_v48, %v1805_v43  ;;  %v1596_v39 = vmul.f32 %v2112_v33, %v1575_v35  ;;  %v1814_v3 = vrot.slane %v1575_v35, %v2628_v52  ;;  %v1597_v11 = vmul.f32 %v2113_v14, %v1580_v32  ;;  %v2118_v35 = vld [vmem:[#allocation2 + $0x60] sm:$0xff]  ;;  %v2119_v33 = vld [vmem:[#allocation2 + $0x78] sm:$0xff] }
 0x481   :  { %v1641_v51 = vrot.slane %v1640_v45, 1  ;;  %v1648_v0 = vrot.slane %v1647_v23, 2  ;;  %v1655_v37 = vrot.slane %v1654_v29, 4  ;;  %v1818_v44 = vrot.slane %v1580_v32, %v2631_v55 }
 0x482   :  { %v1661_v58 = vsel %vm210_vm1, %v1596_v39, 0.0  ;;  %v1662_v22 = vsel %vm210_vm1, %v1597_v11, 0.0  ;;  %v1697_v41 = vsel %vm783_vm7, %v1633_v31, %v1696_v62  ;;  %v1825_v36 = vsel %vm789_vm10, %v1810_v4, %v1824_v25 }
 0x483   :  { %v1642_v59 = vadd.f32 %v1641_v51, %v1640_v45  ;;  %v1649_v20 = vadd.f32 %v1648_v0, %v1647_v23  ;;  %v1656_v57 = vadd.f32 %v1655_v37, %v1654_v29  ;;  %v1663_v40 = vadd.f32 %v1662_v22, %v1661_v58  ;;  %v1401_v1 = vpop.permute.xlu1 %1400  ;;  %v1406_v26 = vpop.permute.xlu0 %1405 }
 0x484   :  { %v1819_v54 = vsel %vm1020_vm4, %v1818_v44, %v1814_v3  ;;  %v1438_v47 = vmul.f32 %v2114_v13, %v1401_v1  ;;  %v1439_v55 = vmul.f32 %v2115_v49, %v1406_v26  ;;  %v1710_v63 = vrot.slane %v1401_v1, %v2628_v52 }
 0x485   :  { %v1657_v2 = vrot.slane %v1656_v57, 2  ;;  %v1664_v46 = vrot.slane %v1663_v40, 4  ;;  %v1714_v5 = vrot.slane %v1406_v26, %v2628_v52  ;;  %v1650_v34 = vrot.slane %v1649_v20, 1 }
 0x486   :  { %v1446_v10 = vsel %vm210_vm1, %v1438_v47, 0.0  ;;  %v1453_v17 = vsel %vm210_vm1, %v1439_v55, 0.0  ;;  %v1826_v28 = vsel %vm791_vm11, %v1819_v54, %v1825_v36  ;;  %v3039_v53 = vsel %vm785_vm8, %v1642_v59, %v1697_v41  ;;  %v2120_v54 = vld [vmem:[#allocation2 + $0x90] sm:$0xff] }
 0x487   :  { %v3036_v16 = vadd.f32 %v1664_v46, %v1663_v40  ;;  %v1447_v30 = vrot.slane %v1446_v10, 4  ;;  %v1454_v56 = vrot.slane %v1453_v17, 4  ;;  %v1411_v50 = vpop.permute.xlu1 %1410  ;;  %v1416_v9 = vpop.permute.xlu0 %1415  ;;  %1828 = vst.msk [vmem:[#allocation14] sm:$0xff] %vm1093_vm12, %v1826_v28  ;;  %v3042_v15 = vadd.f32 %v1657_v2, %v1656_v57 }
 0x488   :  { %v1440_v6 = vmul.f32 %v2116_v7, %v1411_v50  ;;  %v1718_v27 = vrot.slane %v1411_v50, %v2628_v52  ;;  %v1441_v43 = vmul.f32 %v2117_v19, %v1416_v9  ;;  %v1739_v61 = vsel %vm779_vm5, %v1714_v5, %v1710_v63  ;;  %v2121_v50 = vld [vmem:[#allocation2 + $0xa8] sm:$0xff] }
 0x489   :  { %v1448_v8 = vadd.f32 %v1447_v30, %v1446_v10  ;;  %v1455_v18 = vadd.f32 %v1454_v56, %v1453_v17  ;;  %v1722_v24 = vrot.slane %v1416_v9, %v2628_v52  ;;  %v1666_v12 = vrot.slane %v3036_v16, 2 }
 0x48a   :  { %v1460_v38 = vsel %vm210_vm1, %v1440_v6, 0.0  ;;  %v1740_v21 = vsel %vm781_vm6, %v1718_v27, %v1739_v61  ;;  %v1467_v42 = vsel %vm210_vm1, %v1441_v43, 0.0  ;;  %v1651_v25 = vadd.f32 %v1650_v34, %v1649_v20 }
 0x48b   :  { %v1449_v60 = vrot.slane %v1448_v8, 2  ;;  %v1456_v48 = vrot.slane %v1455_v18, 2  ;;  %v1461_v62 = vrot.slane %v1460_v38, 4  ;;  %v1468_v31 = vrot.slane %v1467_v42, 4  ;;  %v1421_v45 = vpop.permute.xlu1 %1420  ;;  %v1426_v23 = vpop.permute.xlu0 %1425 }
 0x48c   :  { %v1741_v29 = vsel %vm783_vm7, %v1722_v24, %v1740_v21  ;;  %v1442_v32 = vmul.f32 %v2118_v35, %v1421_v45  ;;  %v1726_v4 = vrot.slane %v1421_v45, %v2628_v52  ;;  %v1443_v39 = vmul.f32 %v2119_v33, %v1426_v23 }
 0x48d   :  { %v1450_v3 = vadd.f32 %v1449_v60, %v1448_v8  ;;  %v1457_v14 = vadd.f32 %v1456_v48, %v1455_v18  ;;  %v1462_v11 = vadd.f32 %v1461_v62, %v1460_v38  ;;  %v1469_v51 = vadd.f32 %v1468_v31, %v1467_v42 }
 0x48e   :  { %v1474_v0 = vsel %vm210_vm1, %v1442_v32, 0.0  ;;  %v1742_v37 = vsel %vm785_vm8, %v1726_v4, %v1741_v29  ;;  %v1481_v44 = vsel %vm210_vm1, %v1443_v39, 0.0  ;;  %v1730_v26 = vrot.slane %v1426_v23, %v2628_v52 }
 0x48f   :  { %v1451_v58 = vrot.slane %v1450_v3, 1  ;;  %v1458_v22 = vrot.slane %v1457_v14, 1  ;;  %v1463_v41 = vrot.slane %v1462_v11, 2  ;;  %v1470_v59 = vrot.slane %v1469_v51, 2  ;;  %v1431_v57 = vpop.permute.xlu1 %1430  ;;  %v1436_v2 = vpop.permute.xlu0 %1435 }
 0x490   :  { %v1475_v40 = vrot.slane %v1474_v0, 4  ;;  %v1482_v1 = vrot.slane %v1481_v44, 4  ;;  %v1444_v13 = vmul.f32 %v2120_v54, %v1431_v57  ;;  %v1734_v5 = vrot.slane %v1431_v57, %v2628_v52 }
 0x491   :  { %v1452_v47 = vadd.f32 %v1451_v58, %v1450_v3  ;;  %v1459_v49 = vadd.f32 %v1458_v22, %v1457_v14  ;;  %v1464_v55 = vadd.f32 %v1463_v41, %v1462_v11  ;;  %v1471_v36 = vadd.f32 %v1470_v59, %v1469_v51 }
 0x492   :  { %v1476_v46 = vadd.f32 %v1475_v40, %v1474_v0  ;;  %v1483_v63 = vadd.f32 %v1482_v1, %v1481_v44  ;;  %v1488_v20 = vsel %vm210_vm1, %v1444_v13, 0.0  ;;  %v1445_v9 = vmul.f32 %v2121_v50, %v1436_v2 }
 0x493   :  { %v1678_v34 = vsel %vm779_vm5, %v1459_v49, %v1452_v47  ;;  %v1465_v10 = vrot.slane %v1464_v55, 1  ;;  %v1472_v17 = vrot.slane %v1471_v36, 1  ;;  %v1489_v28 = vrot.slane %v1488_v20, 4 }
 0x494   :  { %v1477_v30 = vrot.slane %v1476_v46, 2  ;;  %v1484_v56 = vrot.slane %v1483_v63, 2  ;;  %v1738_v7 = vrot.slane %v1436_v2, %v2628_v52  ;;  %v1659_v43 = vrot.slane %v3042_v15, 1 }
 0x495   :  { %v1466_v6 = vadd.f32 %v1465_v10, %v1464_v55  ;;  %v1473_v27 = vadd.f32 %v1472_v17, %v1471_v36  ;;  %v1490_v19 = vadd.f32 %v1489_v28, %v1488_v20  ;;  %v1495_v61 = vsel %vm210_vm1, %v1445_v9, 0.0 }
 0x496   :  { %v1478_v8 = vadd.f32 %v1477_v30, %v1476_v46  ;;  %v1485_v18 = vadd.f32 %v1484_v56, %v1483_v63  ;;  %v1667_v24 = vadd.f32 %v1666_v12, %v3036_v16  ;;  %v1496_v42 = vrot.slane %v1495_v61, 4 }
 0x497   :  { %v1679_v38 = vsel %vm781_vm6, %v1466_v6, %v1678_v34  ;;  %v1491_v21 = vrot.slane %v1490_v19, 2  ;;  %v1660_v60 = vadd.f32 %v1659_v43, %v3042_v15  ;;  %v1743_v62 = vsel %vm787_vm9, %v1730_v26, %v1742_v37 }
 0x498   :  { %v1479_v52 = vrot.slane %v1478_v8, 1  ;;  %v1486_v48 = vrot.slane %v1485_v18, 1  ;;  %v1668_v31 = vrot.slane %v1667_v24, 1  ;;  %v1680_v45 = vsel %vm783_vm7, %v1473_v27, %v1679_v38 }
 0x499   :  { %v1492_v23 = vadd.f32 %v1491_v21, %v1490_v19  ;;  %v1497_v29 = vadd.f32 %v1496_v42, %v1495_v61  ;;  %v1744_v16 = vsel %vm789_vm10, %v1734_v5, %v1743_v62  ;;  %v1699_v15 = vsel %vm787_vm9, %v1651_v25, %v3039_v53 }
 0x49a   :  { %v1480_v12 = vadd.f32 %v1479_v52, %v1478_v8  ;;  %v1487_v35 = vadd.f32 %v1486_v48, %v1485_v18  ;;  %v1669_v32 = vadd.f32 %v1668_v31, %v1667_v24  ;;  %v1700_v39 = vsel %vm789_vm10, %v1660_v60, %v1699_v15 }
 0x49b   :  { %v1493_v4 = vrot.slane %v1492_v23, 1  ;;  %v1498_v33 = vrot.slane %v1497_v29, 2  ;;  %v1745_v3 = vsel %vm791_vm11, %v1738_v7, %v1744_v16 }
 0x49c   :  { %v1681_v14 = vsel %vm785_vm8, %v1480_v12, %v1680_v45  ;;  %v1701_v11 = vsel %vm791_vm11, %v1669_v32, %v1700_v39  ;;  %1747 = vst.msk [vmem:[#allocation12] sm:$0xff] %vm794_vm13, %v1745_v3 }
 0x49d   :  { %v1494_v51 = vadd.f32 %v1493_v4, %v1492_v23  ;;  %v1499_v0 = vadd.f32 %v1498_v33, %v1497_v29  ;;  %1702 = vrot.lane.b32.xlu1 %v1701_v11, %s2322_s29 }
 0x49e   :  { %2243 = shalt.err (!%p2240_p2)
}
 0x49f   :  { %s2244_s13 = scalar_lea.hbm %s3131_s8, 128 }
 0x4a0   :  { %p2245_p3 = scmp.ne.s32.totalorder %s3131_s8, %s2244_s13  ;;  %p2248_p4 = scmp.lt.u32.totalorder %s2244_s13, %s3131_s8 }
 0x4a2   :  { %p2250_p5 = pnand %p2248_p4, %p2245_p3 }
 0x4a4   :  { %2253 = shalt.err (!%p2250_p5)
}
 0x4a5   :  { %1848 = dma.vmem_to_hbm [thread:$0]  %s1846_s5, 128, %s3131_s8, [#allocation13]  }
 0x4a6   :  { %s2254_s18 = scalar_lea.vmem %s3073_s28, 128  ;;  %p2259_p7 = scmp.lt.s32.totalorder %s3073_s28, %s3073_s28 }
 0x4a7   :  { %p2255_p6 = scmp.ne.s32.totalorder %s3073_s28, %s2254_s18  ;;  %p2260_p8 = scmp.lt.s32.totalorder %s2254_s18, %s2254_s18 }
 0x4a9   :  { %p2261_p9 = por %p2260_p8, %p2259_p7 }
 0x4ab   :  { %p2262_p10 = pnand %p2261_p9, %p2255_p6 }
 0x4ad   :  { %2265 = shalt.err (!%p2262_p10)
}
 0x4ae   :  { %s2266_s21 = scalar_lea.hbm %s3132_s9, 128 }
 0x4af   :  { %p2267_p11 = scmp.ne.s32.totalorder %s3132_s9, %s2266_s21  ;;  %p2270_p12 = scmp.lt.u32.totalorder %s2266_s21, %s3132_s9 }
 0x4b1   :  { %p2272_p13 = pnand %p2270_p12, %p2267_p11 }
 0x4b3   :  { %2275 = shalt.err (!%p2272_p13)
}
 0x4b4   :  { %1858 = dma.vmem_to_hbm [thread:$0]  %s3073_s28, 128, %s3132_s9, [#allocation13]   ;;  %v1500_v53 = vrot.slane %v1499_v0, 1  ;;  %v1682_v37 = vsel %vm787_vm9, %v1487_v35, %v1681_v14  ;;  %vm1705_vm14 = vcmask 523520  }
 0x4b5   :  { %v1683_v44 = vsel %vm789_vm10, %v1494_v51, %v1682_v37  ;;  %s2323_s6 = smov [#allocation11]  }
 0x4b6   :  { %v1501_v25 = vadd.f32 %v1500_v53, %v1499_v0  ;;  %s1835_s10 = sshll.u32 %s2323_s6, 4  ;;  %s1836_s10 = int_to_ptr.vmem [resolvable:$true] %s1835_s10 }
 0x4b7   :  { %s2276_s12 = scalar_lea.vmem %s1836_s10, 128  ;;  %p2281_p1 = scmp.lt.s32.totalorder %s1836_s10, %s1836_s10 }
 0x4b8   :  { %v1684_v58 = vsel %vm791_vm11, %v1501_v25, %v1683_v44  ;;  %p2277_p0 = scmp.ne.s32.totalorder %s1836_s10, %s2276_s12  ;;  %p2282_p2 = scmp.lt.s32.totalorder %s2276_s12, %s2276_s12 }
 0x4b9   :  { %1686 = vst.msk [vmem:[#allocation11] sm:$0xff] %vm210_vm1, %v1684_v58 }
 0x4ba   :  { %p2283_p3 = por %p2282_p2, %p2281_p1 }
 0x4bc   :  { %p2284_p4 = pnand %p2283_p3, %p2277_p0 }
 0x50f   :  { %v1703_v22 = vpop.permute.xlu1 %1702 }
 0x510   :  { %1706 = vst.msk [vmem:[#allocation11] sm:$0xff] %vm1705_vm14, %v1703_v22 }
 0x511   :  { %2287 = shalt.err (!%p2284_p4)
}
 0x512   :  { %s2288_s3 = scalar_lea.hbm %s3130_s7, 128 }
 0x513   :  { %p2289_p5 = scmp.ne.s32.totalorder %s3130_s7, %s2288_s3  ;;  %p2292_p6 = scmp.lt.u32.totalorder %s2288_s3, %s3130_s7 }
 0x515   :  { %p2294_p7 = pnand %p2292_p6, %p2289_p5 }
 0x517   :  { %2297 = shalt.err (!%p2294_p7)
}
 0x518   :  { %1838 = dma.vmem_to_hbm [thread:$0]  %s1836_s10, 128, %s3130_s7, [#allocation4]  }
 0x519   :  { %2304 = dma.done.wait [#allocation4], 128  }
 0x51a   :  { %2305 = vsyncadd [#allocation4], 4294967168 }
 0x51b   :  { %2306 = dma.done.wait [#allocation13], 256  }
 0x51c   :  { %2307 = vsyncadd [#allocation13], 4294967040 }
 0x51d   :  { %1868 = vsyncpa [#allocation3], 1 }
 0x51e   :  { %1869 = vsyncpa [#allocation6], 1 }
 0x51f   :  { %1870 = vsyncpa [#allocation9], 1 }
 0x520   :  { %1871 = vsyncpa [#allocation4], 1 }
 0x521   :  { %1872 = vsyncpa [#allocation13], 1 }

</bundles_post_ra>
